<compile_context>
chip_gen: v6e
topology: v6e:2x2x1
jax: 0.10.0
libtpu: 0.0.40
codegen_flags: <defaults>
</compile_context>

<pallas_src>
import math
import jax
import jax.numpy as jnp
from jax import lax
from jax.experimental import pallas as pl
from jax.experimental.pallas import tpu as pltpu


# ---------------------------------------------------------------------------
# Kernel A: fused pitch-embedding + 3 stacked VariancePredictors (one batch / step)
# ---------------------------------------------------------------------------
def adaptor_kernel(x_ref, mask_ref, pt_ref, bins_ref, ptab_ref,
                   w1_ref, b1_ref, g1_ref, be1_ref,
                   w2_ref, b2_ref, g2_ref, be2_ref,
                   wl_ref, bl_ref,
                   preds_ref, x2_ref, pad_ref):
    L, H = x_ref.shape
    NB = ptab_ref.shape[0]
    S = 3                                   # stacked branches: [duration, pitch, energy]
    SF = wl_ref.shape[1]
    F = SF // S

    x = x_ref[...]                          # (L, H) f32
    mask = mask_ref[...]                    # (L, 1) f32, 1.0 = padded position
    pt = pt_ref[...]                        # (L, 1) f32 pitch target

    # --- torch.bucketize(pitch_target, pitch_bins) + nn.Embedding (one-hot @ table) ---
    n_lt = jnp.sum((bins_ref[...] < pt).astype(jnp.int32), axis=-1, keepdims=True)  # (L,1)
    onehot = (lax.broadcasted_iota(jnp.int32, (L, NB), 1) == n_lt).astype(jnp.bfloat16)
    pitch_emb = jnp.dot(onehot, ptab_ref[...], preferred_element_type=jnp.float32)   # (L,H)
    x2 = x + pitch_emb
    x2_ref[...] = x2

    # --- conv unfolding into a VMEM scratch: lanes = [h[l-1] | h[l] | h[l+1]] ---
    def unfold_into(h, lane0):
        C = h.shape[1]
        z = jnp.zeros((1, C), jnp.float32)
        c0, c1, c2 = lane0, lane0 + C, lane0 + 2 * C
        pad_ref[0:1, c0:c0 + C] = z                       # prev tap, zero left boundary
        pad_ref[1:L, c0:c0 + C] = h[0:L - 1, :]
        pad_ref[:, c1:c1 + C] = h                         # centre tap
        pad_ref[0:L - 1, c2:c2 + C] = h[1:L, :]           # next tap, zero right boundary
        pad_ref[L - 1:L, c2:c2 + C] = z

    def branch_layernorm(a, g, be):                       # LayerNorm over F, per branch (f32)
        a3 = a.reshape(L, S, F)
        mu = jnp.mean(a3, axis=-1, keepdims=True)
        var = jnp.mean(jnp.square(a3 - mu), axis=-1, keepdims=True)
        return ((a3 - mu) * lax.rsqrt(var + 1e-5)).reshape(L, SF) * g + be

    # --- conv1d_1 of all three predictors as ONE bf16 matmul (contraction = 6H) ---
    # duration & pitch branches read x; the energy branch reads x + pitch_embedding
    # (matching the reference, where the energy predictor runs after the pitch add).
    unfold_into(x, 0)
    unfold_into(x2, 3 * H)
    xu = pad_ref[:, 0:6 * H].astype(jnp.bfloat16)                               # (L, 6H)
    a1 = jnp.dot(xu, w1_ref[...], preferred_element_type=jnp.float32)           # (L, 3F)
    h1 = branch_layernorm(jnp.maximum(a1 + b1_ref[...], 0.0), g1_ref[...], be1_ref[...])

    # --- conv1d_2 (block-diagonal stacked weights), ReLU, LayerNorm ---
    unfold_into(h1, 0)
    hu = pad_ref[:, 0:3 * SF].astype(jnp.bfloat16)                              # (L, 9F)
    a2 = jnp.dot(hu, w2_ref[...], preferred_element_type=jnp.float32)           # (L, 3F)
    h2 = branch_layernorm(jnp.maximum(a2 + b2_ref[...], 0.0), g2_ref[...], be2_ref[...])

    # --- Linear(F, 1) per branch + squeeze + masked_fill(mask, 0.0) ---
    logits = jnp.sum((h2 * wl_ref[...]).reshape(L, S, F), axis=-1) + bl_ref[...]  # (L, 3)
    preds_ref[...] = logits * (1.0 - mask)


def run_adaptor_stage1(params, x, src_mask, pitch_target):
    B, L, H = x.shape
    SF = params['wl'].shape[1]
    mask3 = src_mask.astype(jnp.float32).reshape(B, L, 1)
    pt3 = pitch_target.astype(jnp.float32).reshape(B, L, 1)

    def batch_spec(shape):
        nd = len(shape)
        return pl.BlockSpec((None,) + tuple(shape[1:]), lambda b: (b,) + (0,) * (nd - 1))

    def whole_spec(shape):
        nd = len(shape)
        return pl.BlockSpec(tuple(shape), lambda b: (0,) * nd)

    param_order = ('pitch_bins', 'pitch_table', 'w1', 'b1', 'g1', 'be1',
                   'w2', 'b2', 'g2', 'be2', 'wl', 'bl')
    param_args = [params[k] for k in param_order]

    preds, x2 = pl.pallas_call(
        adaptor_kernel,
        out_shape=(jax.ShapeDtypeStruct((B, L, 3), jnp.float32),   # [log_dur, pitch, energy]
                   jax.ShapeDtypeStruct((B, L, H), jnp.float32)),  # x + pitch_embedding
        grid=(B,),
        in_specs=[batch_spec(x.shape), batch_spec(mask3.shape), batch_spec(pt3.shape)]
                 + [whole_spec(a.shape) for a in param_args],
        out_specs=(batch_spec((B, L, 3)), batch_spec((B, L, H))),
        scratch_shapes=[pltpu.VMEM((L, max(6 * H, 3 * SF)), jnp.float32)],
        compiler_params=pltpu.CompilerParams(dimension_semantics=("parallel",)),
    )(x, mask3, pt3, *param_args)
    return preds, x2


# ---------------------------------------------------------------------------
# Kernel B: LengthRegulator — expand each phoneme by its duration, pad to max_len.
# One-hot gather matmul, tiled over the mel axis (parallel grid for v7x's 2 TCs).
# ---------------------------------------------------------------------------
def length_regulator_kernel(x2_ref, cum_ref, out_ref):
    B, Ls, H = x2_ref.shape
    TILE = out_ref.shape[1]
    t0 = pl.program_id(0) * TILE

    cum = cum_ref[...]                                                   # (B, Ls) int32
    t = t0 + lax.broadcasted_iota(jnp.int32, (B, TILE), 1)               # mel frame index
    # source phoneme for frame t: idx = #{ i : cum[i] <= t }
    n_le = jnp.sum((cum[:, None, :] <= t[:, :, None]).astype(jnp.int32), axis=-1)   # (B,TILE)
    b_id = lax.broadcasted_iota(jnp.int32, (B, TILE), 0)
    gsrc = jnp.where(n_le < Ls, b_id * Ls + n_le, -1)                    # -1 -> padded frame
    onehot = (lax.broadcasted_iota(jnp.int32, (B * TILE, B * Ls), 1)
              == gsrc.reshape(B * TILE, 1)).astype(jnp.float32)          # (B*TILE, B*Ls)
    gathered = jnp.dot(onehot, x2_ref[...].reshape(B * Ls, H),
                       preferred_element_type=jnp.float32)               # (B*TILE, H)
    out_ref[...] = gathered.reshape(B, TILE, H)


def run_length_regulator(x2, duration, max_len):
    B, Ls, H = x2.shape
    cum = jnp.cumsum(duration.astype(jnp.int32), axis=1)
    # small demo tile; production would use ~256 frames per tile to stay within
    # v5e's 16 MiB scoped-VMEM default (raise vmem_limit_bytes when scaling up).
    tile = 8 if max_len % 8 == 0 else max_len
    out = pl.pallas_call(
        length_regulator_kernel,
        out_shape=jax.ShapeDtypeStruct((B, max_len, H), jnp.float32),
        grid=(pl.cdiv(max_len, tile),),
        in_specs=[pl.BlockSpec((B, Ls, H), lambda i: (0, 0, 0)),
                  pl.BlockSpec((B, Ls), lambda i: (0, 0))],
        out_specs=pl.BlockSpec((B, tile, H), lambda i: (0, i, 0)),
        compiler_params=pltpu.CompilerParams(dimension_semantics=("parallel",)),
    )(x2, cum)
    mel_len = jnp.sum(duration, axis=1).astype(jnp.int32)
    return out, mel_len


# ---------------------------------------------------------------------------
# VarianceAdaptor forward (phoneme-level pitch & energy, targets provided)
# ---------------------------------------------------------------------------
def variance_adaptor_forward(params, x, src_mask, mel_mask, max_len,
                             pitch_target, energy_target, duration_target,
                             p_control=1.0, e_control=1.0, d_control=1.0):
    # Targets are given -> controls only affect the target-free branch (as in PyTorch).
    preds, x2 = run_adaptor_stage1(params, x, src_mask, pitch_target)
    log_duration_prediction = preds[..., 0]
    pitch_prediction = preds[..., 1]
    energy_prediction = preds[..., 2]
    # NOTE: the reference computes an energy embedding but never adds it to x at
    # phoneme level (dead code) -> dropped here.  energy_target therefore unused.
    duration_rounded = duration_target
    x_out, mel_len = run_length_regulator(x2, duration_target, max_len)
    return (x_out, pitch_prediction, energy_prediction, log_duration_prediction,
            duration_rounded, mel_len, mel_mask)


# ---------------------------------------------------------------------------
# Deterministic synthetic parameters, packed into the stacked kernel layout
# ---------------------------------------------------------------------------
def make_predictor_params(key, H, F):
    k1, k2, k3 = jax.random.split(key, 3)
    s1, s2, sl = 1.0 / math.sqrt(3 * H), 1.0 / math.sqrt(3 * F), 1.0 / math.sqrt(F)
    return {
        'w1': jax.random.normal(k1, (3, H, F), jnp.float32) * s1,   # taps: [prev, cur, next]
        'b1': jnp.zeros((F,), jnp.float32),
        'g1': jnp.ones((F,), jnp.float32),
        'be1': jnp.zeros((F,), jnp.float32),
        'w2': jax.random.normal(k2, (3, F, F), jnp.float32) * s2,
        'b2': jnp.zeros((F,), jnp.float32),
        'g2': jnp.ones((F,), jnp.float32),
        'be2': jnp.zeros((F,), jnp.float32),
        'wl': jax.random.normal(k3, (F,), jnp.float32) * sl,
        'bl': jnp.zeros((1,), jnp.float32),
    }


def pack_adaptor_params(p_dur, p_pitch, p_energy, pitch_bins, pitch_table, H, F):
    branches = (p_dur, p_pitch, p_energy)
    S = 3
    # conv1: stacked input lanes are [unfold(x) (3H) | unfold(x + pitch_emb) (3H)]
    w1 = jnp.zeros((6 * H, S * F), jnp.float32)
    w1 = w1.at[0:3 * H, 0:F].set(p_dur['w1'].reshape(3 * H, F))
    w1 = w1.at[0:3 * H, F:2 * F].set(p_pitch['w1'].reshape(3 * H, F))
    w1 = w1.at[3 * H:6 * H, 2 * F:3 * F].set(p_energy['w1'].reshape(3 * H, F))
    # conv2: block-diagonal per tap (input lanes = [prev h1 | cur h1 | next h1], each S*F)
    w2 = jnp.zeros((3 * S * F, S * F), jnp.float32)
    for tap in range(3):
        for s, p in enumerate(branches):
            r0 = tap * S * F + s * F
            w2 = w2.at[r0:r0 + F, s * F:(s + 1) * F].set(p['w2'][tap])
    cat = lambda k: jnp.concatenate([p[k].reshape(1, -1) for p in branches], axis=-1)
    return {
        'w1': w1.astype(jnp.bfloat16),
        'b1': cat('b1'), 'g1': cat('g1'), 'be1': cat('be1'),
        'w2': w2.astype(jnp.bfloat16),
        'b2': cat('b2'), 'g2': cat('g2'), 'be2': cat('be2'),
        'wl': cat('wl'),
        'bl': jnp.concatenate([p['bl'].reshape(1, 1) for p in branches], axis=-1),   # (1, 3)
        'pitch_bins': pitch_bins.reshape(1, -1),
        'pitch_table': pitch_table.astype(jnp.bfloat16),
    }


def make_params(key, H=32, F=32, n_bins=32, pitch_min=-2.0, pitch_max=10.0):
    kd, kp, ke, kt = jax.random.split(key, 4)
    # stats.json replaced by in-script constants; energy bins/embedding omitted because
    # the reference forward never uses the energy embedding (dead code).
    pitch_bins = jnp.linspace(pitch_min, pitch_max, n_bins - 1, dtype=jnp.float32)
    pitch_table = jax.random.normal(kt, (n_bins, H), jnp.float32) * 0.1
    return pack_adaptor_params(make_predictor_params(kd, H, F),
                               make_predictor_params(kp, H, F),
                               make_predictor_params(ke, H, F),
                               pitch_bins, pitch_table, H, F)


if __name__ == "__main__":
    B, L_src, H, F, n_bins = 2, 8, 32, 32, 32
    max_len = 16

    key = jax.random.PRNGKey(0)
    kx, kp, ke, kparam = jax.random.split(key, 4)

    params = make_params(kparam, H=H, F=F, n_bins=n_bins)

    x = jax.random.normal(kx, (B, L_src, H), jnp.float32)

    src_lens = jnp.array([8, 6], jnp.int32)
    src_mask = jnp.arange(L_src)[None, :] >= src_lens[:, None]           # True = padded

    pitch_target = jax.random.uniform(kp, (B, L_src), jnp.float32, -2.0, 10.0)
    energy_target = jax.random.uniform(ke, (B, L_src), jnp.float32, 0.0, 5.0)
    duration_target = jnp.array([[2, 3, 1, 2, 2, 1, 2, 1],
                                 [1, 2, 2, 1, 2, 1, 0, 0]], jnp.int32)

    mel_lens = jnp.sum(duration_target, axis=1)
    mel_mask = jnp.arange(max_len)[None, :] >= mel_lens[:, None]

    forward = jax.jit(variance_adaptor_forward, static_argnames=("max_len",))
    outs = forward(params, x, src_mask, mel_mask, max_len=max_len,
                   pitch_target=pitch_target, energy_target=energy_target,
                   duration_target=duration_target)

    (x_out, pitch_pred, energy_pred, log_dur_pred,
     dur_rounded, mel_len, mel_mask_out) = outs

    jax.block_until_ready(x_out)
    jax.block_until_ready(pitch_pred)
    jax.block_until_ready(energy_pred)
    jax.block_until_ready(log_dur_pred)
    jax.block_until_ready(mel_len)

    assert x_out.shape == (B, max_len, H)
    assert pitch_pred.shape == (B, L_src)
    assert energy_pred.shape == (B, L_src)
    assert log_dur_pred.shape == (B, L_src)
    assert bool(jnp.all(jnp.isfinite(x_out)))
    # frames beyond the total duration are zero-padded (LengthRegulator pad semantics)
    assert bool(jnp.all(x_out[1, int(mel_len[1]):, :] == 0.0))
    # masked (padded) source positions produce exactly-zero predictions (masked_fill)
    assert bool(jnp.all(pitch_pred[1, int(src_lens[1]):] == 0.0))

    print("KERNEL_OK")
</pallas_src>

<mosaic_0001>
module attributes {stable_mosaic.version = 11 : i64} {
  func.func @length_regulator_kernel(%arg0: i32, %arg1: memref<2x8x32xf32, #tpu.memory_space<vmem>>, %arg2: memref<2x8xi32, #tpu.memory_space<vmem>>, %arg3: memref<2x8x32xf32, #tpu.memory_space<vmem>>) attributes {dimension_semantics = [#tpu.dimension_semantics<parallel>], iteration_bounds = array<i64: 2>, scalar_prefetch = 0 : i64, scratch_operands = 0 : i64, tpu.core_type = #tpu.core_type<tc>, window_params = [{pipeline_mode = #tpu.pipeline_mode<synchronous>, transform_indices = @transform_0, window_bounds = array<i64: 2, 8, 32>}, {pipeline_mode = #tpu.pipeline_mode<synchronous>, transform_indices = @transform_1, window_bounds = array<i64: 2, 8>}, {transform_indices = @transform_2, window_bounds = array<i64: 2, 8, 32>}]} {
    %c8_i32 = arith.constant 8 : i32
    %0 = arith.muli %arg0, %c8_i32 : i32
    %c0 = arith.constant 0 : index
    %c0_0 = arith.constant 0 : index
    %1 = vector.load %arg2[%c0, %c0_0] : memref<2x8xi32, #tpu.memory_space<vmem>>, vector<2x8xi32>
    %2 = tpu.iota {dimensions = array<i32: 1>} : vector<2x8xi32>
    %3 = vector.broadcast %0 : i32 to vector<2x8xi32>
    %4 = arith.addi %3, %2 : vector<2x8xi32>
    %5 = vector.shape_cast %1 : vector<2x8xi32> to vector<2x1x8xi32>
    %6 = vector.shape_cast %4 : vector<2x8xi32> to vector<2x8x1xi32>
    %7 = vector.broadcast %5 : vector<2x1x8xi32> to vector<2x8x8xi32>
    %8 = vector.broadcast %6 : vector<2x8x1xi32> to vector<2x8x8xi32>
    %9 = arith.cmpi sle, %7, %8 : vector<2x8x8xi32>
    %10 = arith.extui %9 : vector<2x8x8xi1> to vector<2x8x8xi32>
    %cst = arith.constant dense<0> : vector<2x8xi32>
    %11 = vector.multi_reduction <add>, %10, %cst [2] : vector<2x8x8xi32> to vector<2x8xi32>
    %12 = tpu.iota {dimensions = array<i32: 0>} : vector<2x8xi32>
    %c8_i32_1 = arith.constant 8 : i32
    %13 = vector.broadcast %c8_i32_1 : i32 to vector<2x8xi32>
    %14 = arith.cmpi slt, %11, %13 : vector<2x8xi32>
    %c8_i32_2 = arith.constant 8 : i32
    %15 = vector.broadcast %c8_i32_2 : i32 to vector<2x8xi32>
    %16 = arith.muli %12, %15 : vector<2x8xi32>
    %17 = arith.addi %16, %11 : vector<2x8xi32>
    %c-1_i32 = arith.constant -1 : i32
    %18 = vector.broadcast %c-1_i32 : i32 to vector<2x8xi32>
    %19 = arith.select %14, %17, %18 : vector<2x8xi1>, vector<2x8xi32>
    %20 = tpu.iota {dimensions = array<i32: 1>} : vector<16x16xi32>
    %21 = vector.shape_cast %19 : vector<2x8xi32> to vector<16x1xi32>
    %22 = vector.broadcast %21 : vector<16x1xi32> to vector<16x16xi32>
    %23 = arith.cmpi eq, %20, %22 : vector<16x16xi32>
    %24 = arith.extui %23 : vector<16x16xi1> to vector<16x16xi32>
    %25 = arith.sitofp %24 : vector<16x16xi32> to vector<16x16xf32>
    %c0_3 = arith.constant 0 : index
    %c0_4 = arith.constant 0 : index
    %c0_5 = arith.constant 0 : index
    %26 = vector.load %arg1[%c0_3, %c0_4, %c0_5] : memref<2x8x32xf32, #tpu.memory_space<vmem>>, vector<2x8x32xf32>
    %27 = vector.shape_cast %26 : vector<2x8x32xf32> to vector<16x32xf32>
    %cst_6 = arith.constant dense<0.000000e+00> : vector<16x32xf32>
    %28 = tpu.matmul %25, %27, %cst_6 {dimension_numbers = #tpu.dot_dimension_numbers<[1], [0], [0], [1], [0, 0, 1, 1], [], []>} : vector<16x16xf32>, vector<16x32xf32>, vector<16x32xf32> -> vector<16x32xf32>
    %29 = vector.shape_cast %28 : vector<16x32xf32> to vector<2x8x32xf32>
    %c0_7 = arith.constant 0 : index
    %c0_8 = arith.constant 0 : index
    %c0_9 = arith.constant 0 : index
    %30 = vector.load %arg3[%c0_7, %c0_8, %c0_9] : memref<2x8x32xf32, #tpu.memory_space<vmem>>, vector<2x8x32xf32>
    tpu.vector_store %arg3[%c0_7, %c0_8, %c0_9], %29 {strides = array<i32>} : memref<2x8x32xf32, #tpu.memory_space<vmem>>, vector<2x8x32xf32>,
    return
  }
  func.func @transform_0(%arg0: i32) -> (i32, i32, i32) {
    %c0_i32 = arith.constant 0 : i32
    %c0_i32_0 = arith.constant 0 : i32
    %c0_i32_1 = arith.constant 0 : i32
    %c0_i32_2 = arith.constant 0 : i32
    return %c0_i32, %c0_i32_0, %c0_i32_1 : i32, i32, i32
  }
  func.func @transform_1(%arg0: i32) -> (i32, i32) {
    %c0_i32 = arith.constant 0 : i32
    %c0_i32_0 = arith.constant 0 : i32
    %c0_i32_1 = arith.constant 0 : i32
    return %c0_i32, %c0_i32_0 : i32, i32
  }
  func.func @transform_2(%arg0: i32) -> (i32, i32, i32) {
    %c0_i32 = arith.constant 0 : i32
    %c0_i32_0 = arith.constant 0 : i32
    %c0_i32_1 = arith.constant 0 : i32
    return %c0_i32, %arg0, %c0_i32_0 : i32, i32, i32
  }
}

module attributes {stable_mosaic.version = 11 : i64} {
  func.func @adaptor_kernel(%arg0: i32, %arg1: memref<1x8x32xf32, #tpu.memory_space<vmem>>, %arg2: memref<1x8x1xf32, #tpu.memory_space<vmem>>, %arg3: memref<1x8x1xf32, #tpu.memory_space<vmem>>, %arg4: memref<1x31xf32, #tpu.memory_space<vmem>>, %arg5: memref<32x32xbf16, #tpu.memory_space<vmem>>, %arg6: memref<192x96xbf16, #tpu.memory_space<vmem>>, %arg7: memref<1x96xf32, #tpu.memory_space<vmem>>, %arg8: memref<1x96xf32, #tpu.memory_space<vmem>>, %arg9: memref<1x96xf32, #tpu.memory_space<vmem>>, %arg10: memref<288x96xbf16, #tpu.memory_space<vmem>>, %arg11: memref<1x96xf32, #tpu.memory_space<vmem>>, %arg12: memref<1x96xf32, #tpu.memory_space<vmem>>, %arg13: memref<1x96xf32, #tpu.memory_space<vmem>>, %arg14: memref<1x96xf32, #tpu.memory_space<vmem>>, %arg15: memref<1x3xf32, #tpu.memory_space<vmem>>, %arg16: memref<1x8x3xf32, #tpu.memory_space<vmem>>, %arg17: memref<1x8x32xf32, #tpu.memory_space<vmem>>, %arg18: memref<8x288xf32, #tpu.memory_space<vmem>>) attributes {dimension_semantics = [#tpu.dimension_semantics<parallel>], iteration_bounds = array<i64: 2>, scalar_prefetch = 0 : i64, scratch_operands = 1 : i64, tpu.core_type = #tpu.core_type<tc>, window_params = [{transform_indices = @transform_0, window_bounds = array<i64: 1, 8, 32>}, {transform_indices = @transform_1, window_bounds = array<i64: 1, 8, 1>}, {transform_indices = @transform_2, window_bounds = array<i64: 1, 8, 1>}, {pipeline_mode = #tpu.pipeline_mode<synchronous>, transform_indices = @transform_3, window_bounds = array<i64: 1, 31>}, {pipeline_mode = #tpu.pipeline_mode<synchronous>, transform_indices = @transform_4, window_bounds = array<i64: 32, 32>}, {pipeline_mode = #tpu.pipeline_mode<synchronous>, transform_indices = @transform_5, window_bounds = array<i64: 192, 96>}, {pipeline_mode = #tpu.pipeline_mode<synchronous>, transform_indices = @transform_6, window_bounds = array<i64: 1, 96>}, {pipeline_mode = #tpu.pipeline_mode<synchronous>, transform_indices = @transform_7, window_bounds = array<i64: 1, 96>}, {pipeline_mode = #tpu.pipeline_mode<synchronous>, transform_indices = @transform_8, window_bounds = array<i64: 1, 96>}, {pipeline_mode = #tpu.pipeline_mode<synchronous>, transform_indices = @transform_9, window_bounds = array<i64: 288, 96>}, {pipeline_mode = #tpu.pipeline_mode<synchronous>, transform_indices = @transform_10, window_bounds = array<i64: 1, 96>}, {pipeline_mode = #tpu.pipeline_mode<synchronous>, transform_indices = @transform_11, window_bounds = array<i64: 1, 96>}, {pipeline_mode = #tpu.pipeline_mode<synchronous>, transform_indices = @transform_12, window_bounds = array<i64: 1, 96>}, {pipeline_mode = #tpu.pipeline_mode<synchronous>, transform_indices = @transform_13, window_bounds = array<i64: 1, 96>}, {pipeline_mode = #tpu.pipeline_mode<synchronous>, transform_indices = @transform_14, window_bounds = array<i64: 1, 3>}, {transform_indices = @transform_15, window_bounds = array<i64: 1, 8, 3>}, {transform_indices = @transform_16, window_bounds = array<i64: 1, 8, 32>}]} {
    %c0 = arith.constant 0 : index
    %c0_0 = arith.constant 0 : index
    %c0_1 = arith.constant 0 : index
    %0 = vector.load %arg1[%c0, %c0_0, %c0_1] : memref<1x8x32xf32, #tpu.memory_space<vmem>>, vector<1x8x32xf32>
    %1 = vector.shape_cast %0 : vector<1x8x32xf32> to vector<8x32xf32>
    %c0_2 = arith.constant 0 : index
    %c0_3 = arith.constant 0 : index
    %c0_4 = arith.constant 0 : index
    %2 = vector.load %arg2[%c0_2, %c0_3, %c0_4] : memref<1x8x1xf32, #tpu.memory_space<vmem>>, vector<1x8x1xf32>
    %3 = vector.shape_cast %2 : vector<1x8x1xf32> to vector<8x1xf32>
    %c0_5 = arith.constant 0 : index
    %c0_6 = arith.constant 0 : index
    %c0_7 = arith.constant 0 : index
    %4 = vector.load %arg3[%c0_5, %c0_6, %c0_7] : memref<1x8x1xf32, #tpu.memory_space<vmem>>, vector<1x8x1xf32>
    %5 = vector.shape_cast %4 : vector<1x8x1xf32> to vector<8x1xf32>
    %c0_8 = arith.constant 0 : index
    %c0_9 = arith.constant 0 : index
    %6 = vector.load %arg4[%c0_8, %c0_9] : memref<1x31xf32, #tpu.memory_space<vmem>>, vector<1x31xf32>
    %7 = vector.broadcast %6 : vector<1x31xf32> to vector<8x31xf32>
    %8 = vector.broadcast %5 : vector<8x1xf32> to vector<8x31xf32>
    %9 = arith.cmpf olt, %7, %8 : vector<8x31xf32>
    %10 = arith.extui %9 : vector<8x31xi1> to vector<8x31xi32>
    %cst = arith.constant dense<0> : vector<8xi32>
    %11 = vector.multi_reduction <add>, %10, %cst [1] : vector<8x31xi32> to vector<8xi32>
    %12 = vector.shape_cast %11 : vector<8xi32> to vector<8x1xi32>
    %13 = tpu.iota {dimensions = array<i32: 1>} : vector<8x32xi32>
    %14 = vector.broadcast %12 : vector<8x1xi32> to vector<8x32xi32>
    %15 = arith.cmpi eq, %13, %14 : vector<8x32xi32>
    %16 = arith.extui %15 : vector<8x32xi1> to vector<8x32xi32>
    %17 = arith.sitofp %16 : vector<8x32xi32> to vector<8x32xf32>
    %18 = arith.truncf %17 : vector<8x32xf32> to vector<8x32xbf16>
    %c0_10 = arith.constant 0 : index
    %c0_11 = arith.constant 0 : index
    %19 = vector.load %arg5[%c0_10, %c0_11] : memref<32x32xbf16, #tpu.memory_space<vmem>>, vector<32x32xbf16>
    %cst_12 = arith.constant dense<0.000000e+00> : vector<8x32xf32>
    %20 = tpu.matmul %18, %19, %cst_12 {dimension_numbers = #tpu.dot_dimension_numbers<[1], [0], [0], [1], [0, 0, 1, 1], [], []>} : vector<8x32xbf16>, vector<32x32xbf16>, vector<8x32xf32> -> vector<8x32xf32>
    %21 = arith.addf %1, %20 : vector<8x32xf32>
    %c0_13 = arith.constant 0 : index
    %c0_14 = arith.constant 0 : index
    %c0_15 = arith.constant 0 : index
    %22 = vector.load %arg17[%c0_13, %c0_14, %c0_15] : memref<1x8x32xf32, #tpu.memory_space<vmem>>, vector<1x8x32xf32>
    %23 = vector.shape_cast %22 : vector<1x8x32xf32> to vector<8x32xf32>
    %24 = vector.shape_cast %21 : vector<8x32xf32> to vector<1x8x32xf32>
    tpu.vector_store %arg17[%c0_13, %c0_14, %c0_15], %24 {strides = array<i32>} : memref<1x8x32xf32, #tpu.memory_space<vmem>>, vector<1x8x32xf32>,
    %cst_16 = arith.constant 0.000000e+00 : f32
    %25 = vector.broadcast %cst_16 : f32 to vector<1x32xf32>
    %c0_17 = arith.constant 0 : index
    %c0_18 = arith.constant 0 : index
    %26 = vector.load %arg18[%c0_17, %c0_18] : memref<8x288xf32, #tpu.memory_space<vmem>>, vector<1x32xf32>
    tpu.vector_store %arg18[%c0_17, %c0_18], %25 {strides = array<i32>} : memref<8x288xf32, #tpu.memory_space<vmem>>, vector<1x32xf32>,
    %27 = vector.extract_strided_slice %1 {offsets = [0, 0], sizes = [7, 32], strides = [1, 1]} : vector<8x32xf32> to vector<7x32xf32>
    %c1 = arith.constant 1 : index
    %c0_19 = arith.constant 0 : index
    %28 = vector.load %arg18[%c1, %c0_19] : memref<8x288xf32, #tpu.memory_space<vmem>>, vector<7x32xf32>
    tpu.vector_store %arg18[%c1, %c0_19], %27 {strides = array<i32>} : memref<8x288xf32, #tpu.memory_space<vmem>>, vector<7x32xf32>,
    %c0_20 = arith.constant 0 : index
    %c32 = arith.constant 32 : index
    %29 = vector.load %arg18[%c0_20, %c32] : memref<8x288xf32, #tpu.memory_space<vmem>>, vector<8x32xf32>
    tpu.vector_store %arg18[%c0_20, %c32], %1 {strides = array<i32>} : memref<8x288xf32, #tpu.memory_space<vmem>>, vector<8x32xf32>,
    %30 = vector.extract_strided_slice %1 {offsets = [1, 0], sizes = [7, 32], strides = [1, 1]} : vector<8x32xf32> to vector<7x32xf32>
    %c0_21 = arith.constant 0 : index
    %c64 = arith.constant 64 : index
    %31 = vector.load %arg18[%c0_21, %c64] : memref<8x288xf32, #tpu.memory_space<vmem>>, vector<7x32xf32>
    tpu.vector_store %arg18[%c0_21, %c64], %30 {strides = array<i32>} : memref<8x288xf32, #tpu.memory_space<vmem>>, vector<7x32xf32>,
    %c7 = arith.constant 7 : index
    %c64_22 = arith.constant 64 : index
    %32 = vector.load %arg18[%c7, %c64_22] : memref<8x288xf32, #tpu.memory_space<vmem>>, vector<1x32xf32>
    tpu.vector_store %arg18[%c7, %c64_22], %25 {strides = array<i32>} : memref<8x288xf32, #tpu.memory_space<vmem>>, vector<1x32xf32>,
    %cst_23 = arith.constant 0.000000e+00 : f32
    %33 = vector.broadcast %cst_23 : f32 to vector<1x32xf32>
    %c0_24 = arith.constant 0 : index
    %c96 = arith.constant 96 : index
    %34 = vector.load %arg18[%c0_24, %c96] : memref<8x288xf32, #tpu.memory_space<vmem>>, vector<1x32xf32>
    tpu.vector_store %arg18[%c0_24, %c96], %33 {strides = array<i32>} : memref<8x288xf32, #tpu.memory_space<vmem>>, vector<1x32xf32>,
    %35 = vector.extract_strided_slice %21 {offsets = [0, 0], sizes = [7, 32], strides = [1, 1]} : vector<8x32xf32> to vector<7x32xf32>
    %c1_25 = arith.constant 1 : index
    %c96_26 = arith.constant 96 : index
    %36 = vector.load %arg18[%c1_25, %c96_26] : memref<8x288xf32, #tpu.memory_space<vmem>>, vector<7x32xf32>
    tpu.vector_store %arg18[%c1_25, %c96_26], %35 {strides = array<i32>} : memref<8x288xf32, #tpu.memory_space<vmem>>, vector<7x32xf32>,
    %c0_27 = arith.constant 0 : index
    %c128 = arith.constant 128 : index
    %37 = vector.load %arg18[%c0_27, %c128] : memref<8x288xf32, #tpu.memory_space<vmem>>, vector<8x32xf32>
    tpu.vector_store %arg18[%c0_27, %c128], %21 {strides = array<i32>} : memref<8x288xf32, #tpu.memory_space<vmem>>, vector<8x32xf32>,
    %38 = vector.extract_strided_slice %21 {offsets = [1, 0], sizes = [7, 32], strides = [1, 1]} : vector<8x32xf32> to vector<7x32xf32>
    %c0_28 = arith.constant 0 : index
    %c160 = arith.constant 160 : index
    %39 = vector.load %arg18[%c0_28, %c160] : memref<8x288xf32, #tpu.memory_space<vmem>>, vector<7x32xf32>
    tpu.vector_store %arg18[%c0_28, %c160], %38 {strides = array<i32>} : memref<8x288xf32, #tpu.memory_space<vmem>>, vector<7x32xf32>,
    %c7_29 = arith.constant 7 : index
    %c160_30 = arith.constant 160 : index
    %40 = vector.load %arg18[%c7_29, %c160_30] : memref<8x288xf32, #tpu.memory_space<vmem>>, vector<1x32xf32>
    tpu.vector_store %arg18[%c7_29, %c160_30], %33 {strides = array<i32>} : memref<8x288xf32, #tpu.memory_space<vmem>>, vector<1x32xf32>,
    %c0_31 = arith.constant 0 : index
    %c0_32 = arith.constant 0 : index
    %41 = vector.load %arg18[%c0_31, %c0_32] : memref<8x288xf32, #tpu.memory_space<vmem>>, vector<8x192xf32>
    %42 = arith.truncf %41 : vector<8x192xf32> to vector<8x192xbf16>
    %c0_33 = arith.constant 0 : index
    %c0_34 = arith.constant 0 : index
    %43 = vector.load %arg6[%c0_33, %c0_34] : memref<192x96xbf16, #tpu.memory_space<vmem>>, vector<192x96xbf16>
    %cst_35 = arith.constant dense<0.000000e+00> : vector<8x96xf32>
    %44 = tpu.matmul %42, %43, %cst_35 {dimension_numbers = #tpu.dot_dimension_numbers<[1], [0], [0], [1], [0, 0, 1, 1], [], []>} : vector<8x192xbf16>, vector<192x96xbf16>, vector<8x96xf32> -> vector<8x96xf32>
    %c0_36 = arith.constant 0 : index
    %c0_37 = arith.constant 0 : index
    %45 = vector.load %arg7[%c0_36, %c0_37] : memref<1x96xf32, #tpu.memory_space<vmem>>, vector<1x96xf32>
    %46 = vector.broadcast %45 : vector<1x96xf32> to vector<8x96xf32>
    %47 = arith.addf %44, %46 : vector<8x96xf32>
    %cst_38 = arith.constant 0.000000e+00 : f32
    %48 = vector.broadcast %cst_38 : f32 to vector<8x96xf32>
    %49 = arith.maximumf %47, %48 : vector<8x96xf32>
    %c0_39 = arith.constant 0 : index
    %c0_40 = arith.constant 0 : index
    %50 = vector.load %arg8[%c0_39, %c0_40] : memref<1x96xf32, #tpu.memory_space<vmem>>, vector<1x96xf32>
    %c0_41 = arith.constant 0 : index
    %c0_42 = arith.constant 0 : index
    %51 = vector.load %arg9[%c0_41, %c0_42] : memref<1x96xf32, #tpu.memory_space<vmem>>, vector<1x96xf32>
    %52 = vector.shape_cast %49 : vector<8x96xf32> to vector<8x3x32xf32>
    %cst_43 = arith.constant dense<0.000000e+00> : vector<8x3xf32>
    %53 = vector.multi_reduction <add>, %52, %cst_43 [2] : vector<8x3x32xf32> to vector<8x3xf32>
    %54 = vector.shape_cast %53 : vector<8x3xf32> to vector<8x3x1xf32>
    %cst_44 = arith.constant 3.200000e+01 : f32
    %55 = vector.broadcast %cst_44 : f32 to vector<8x3x1xf32>
    %56 = arith.divf %54, %55 : vector<8x3x1xf32>
    %57 = vector.broadcast %56 : vector<8x3x1xf32> to vector<8x3x32xf32>
    %58 = arith.subf %52, %57 : vector<8x3x32xf32>
    %59 = arith.mulf %58, %58 : vector<8x3x32xf32>
    %cst_45 = arith.constant dense<0.000000e+00> : vector<8x3xf32>
    %60 = vector.multi_reduction <add>, %59, %cst_45 [2] : vector<8x3x32xf32> to vector<8x3xf32>
    %61 = vector.shape_cast %60 : vector<8x3xf32> to vector<8x3x1xf32>
    %cst_46 = arith.constant 3.200000e+01 : f32
    %62 = vector.broadcast %cst_46 : f32 to vector<8x3x1xf32>
    %63 = arith.divf %61, %62 : vector<8x3x1xf32>
    %64 = vector.broadcast %56 : vector<8x3x1xf32> to vector<8x3x32xf32>
    %65 = arith.subf %52, %64 : vector<8x3x32xf32>
    %cst_47 = arith.constant 9.99999974E-6 : f32
    %66 = vector.broadcast %cst_47 : f32 to vector<8x3x1xf32>
    %67 = arith.addf %63, %66 : vector<8x3x1xf32>
    %68 = math.rsqrt %67 : vector<8x3x1xf32>
    %69 = vector.broadcast %68 : vector<8x3x1xf32> to vector<8x3x32xf32>
    %70 = arith.mulf %65, %69 : vector<8x3x32xf32>
    %71 = vector.shape_cast %70 : vector<8x3x32xf32> to vector<8x96xf32>
    %72 = vector.broadcast %50 : vector<1x96xf32> to vector<8x96xf32>
    %73 = arith.mulf %71, %72 : vector<8x96xf32>
    %74 = vector.broadcast %51 : vector<1x96xf32> to vector<8x96xf32>
    %75 = arith.addf %73, %74 : vector<8x96xf32>
    %cst_48 = arith.constant 0.000000e+00 : f32
    %76 = vector.broadcast %cst_48 : f32 to vector<1x96xf32>
    %c0_49 = arith.constant 0 : index
    %c0_50 = arith.constant 0 : index
    %77 = vector.load %arg18[%c0_49, %c0_50] : memref<8x288xf32, #tpu.memory_space<vmem>>, vector<1x96xf32>
    tpu.vector_store %arg18[%c0_49, %c0_50], %76 {strides = array<i32>} : memref<8x288xf32, #tpu.memory_space<vmem>>, vector<1x96xf32>,
    %78 = vector.extract_strided_slice %75 {offsets = [0, 0], sizes = [7, 96], strides = [1, 1]} : vector<8x96xf32> to vector<7x96xf32>
    %c1_51 = arith.constant 1 : index
    %c0_52 = arith.constant 0 : index
    %79 = vector.load %arg18[%c1_51, %c0_52] : memref<8x288xf32, #tpu.memory_space<vmem>>, vector<7x96xf32>
    tpu.vector_store %arg18[%c1_51, %c0_52], %78 {strides = array<i32>} : memref<8x288xf32, #tpu.memory_space<vmem>>, vector<7x96xf32>,
    %c0_53 = arith.constant 0 : index
    %c96_54 = arith.constant 96 : index
    %80 = vector.load %arg18[%c0_53, %c96_54] : memref<8x288xf32, #tpu.memory_space<vmem>>, vector<8x96xf32>
    tpu.vector_store %arg18[%c0_53, %c96_54], %75 {strides = array<i32>} : memref<8x288xf32, #tpu.memory_space<vmem>>, vector<8x96xf32>,
    %81 = vector.extract_strided_slice %75 {offsets = [1, 0], sizes = [7, 96], strides = [1, 1]} : vector<8x96xf32> to vector<7x96xf32>
    %c0_55 = arith.constant 0 : index
    %c192 = arith.constant 192 : index
    %82 = vector.load %arg18[%c0_55, %c192] : memref<8x288xf32, #tpu.memory_space<vmem>>, vector<7x96xf32>
    tpu.vector_store %arg18[%c0_55, %c192], %81 {strides = array<i32>} : memref<8x288xf32, #tpu.memory_space<vmem>>, vector<7x96xf32>,
    %c7_56 = arith.constant 7 : index
    %c192_57 = arith.constant 192 : index
    %83 = vector.load %arg18[%c7_56, %c192_57] : memref<8x288xf32, #tpu.memory_space<vmem>>, vector<1x96xf32>
    tpu.vector_store %arg18[%c7_56, %c192_57], %76 {strides = array<i32>} : memref<8x288xf32, #tpu.memory_space<vmem>>, vector<1x96xf32>,
    %c0_58 = arith.constant 0 : index
    %c0_59 = arith.constant 0 : index
    %84 = vector.load %arg18[%c0_58, %c0_59] : memref<8x288xf32, #tpu.memory_space<vmem>>, vector<8x288xf32>
    %85 = arith.truncf %84 : vector<8x288xf32> to vector<8x288xbf16>
    %c0_60 = arith.constant 0 : index
    %c0_61 = arith.constant 0 : index
    %86 = vector.load %arg10[%c0_60, %c0_61] : memref<288x96xbf16, #tpu.memory_space<vmem>>, vector<288x96xbf16>
    %cst_62 = arith.constant dense<0.000000e+00> : vector<8x96xf32>
    %87 = tpu.matmul %85, %86, %cst_62 {dimension_numbers = #tpu.dot_dimension_numbers<[1], [0], [0], [1], [0, 0, 1, 1], [], []>} : vector<8x288xbf16>, vector<288x96xbf16>, vector<8x96xf32> -> vector<8x96xf32>
    %c0_63 = arith.constant 0 : index
    %c0_64 = arith.constant 0 : index
    %88 = vector.load %arg11[%c0_63, %c0_64] : memref<1x96xf32, #tpu.memory_space<vmem>>, vector<1x96xf32>
    %89 = vector.broadcast %88 : vector<1x96xf32> to vector<8x96xf32>
    %90 = arith.addf %87, %89 : vector<8x96xf32>
    %cst_65 = arith.constant 0.000000e+00 : f32
    %91 = vector.broadcast %cst_65 : f32 to vector<8x96xf32>
    %92 = arith.maximumf %90, %91 : vector<8x96xf32>
    %c0_66 = arith.constant 0 : index
    %c0_67 = arith.constant 0 : index
    %93 = vector.load %arg12[%c0_66, %c0_67] : memref<1x96xf32, #tpu.memory_space<vmem>>, vector<1x96xf32>
    %c0_68 = arith.constant 0 : index
    %c0_69 = arith.constant 0 : index
    %94 = vector.load %arg13[%c0_68, %c0_69] : memref<1x96xf32, #tpu.memory_space<vmem>>, vector<1x96xf32>
    %95 = vector.shape_cast %92 : vector<8x96xf32> to vector<8x3x32xf32>
    %cst_70 = arith.constant dense<0.000000e+00> : vector<8x3xf32>
    %96 = vector.multi_reduction <add>, %95, %cst_70 [2] : vector<8x3x32xf32> to vector<8x3xf32>
    %97 = vector.shape_cast %96 : vector<8x3xf32> to vector<8x3x1xf32>
    %cst_71 = arith.constant 3.200000e+01 : f32
    %98 = vector.broadcast %cst_71 : f32 to vector<8x3x1xf32>
    %99 = arith.divf %97, %98 : vector<8x3x1xf32>
    %100 = vector.broadcast %99 : vector<8x3x1xf32> to vector<8x3x32xf32>
    %101 = arith.subf %95, %100 : vector<8x3x32xf32>
    %102 = arith.mulf %101, %101 : vector<8x3x32xf32>
    %cst_72 = arith.constant dense<0.000000e+00> : vector<8x3xf32>
    %103 = vector.multi_reduction <add>, %102, %cst_72 [2] : vector<8x3x32xf32> to vector<8x3xf32>
    %104 = vector.shape_cast %103 : vector<8x3xf32> to vector<8x3x1xf32>
    %cst_73 = arith.constant 3.200000e+01 : f32
    %105 = vector.broadcast %cst_73 : f32 to vector<8x3x1xf32>
    %106 = arith.divf %104, %105 : vector<8x3x1xf32>
    %107 = vector.broadcast %99 : vector<8x3x1xf32> to vector<8x3x32xf32>
    %108 = arith.subf %95, %107 : vector<8x3x32xf32>
    %cst_74 = arith.constant 9.99999974E-6 : f32
    %109 = vector.broadcast %cst_74 : f32 to vector<8x3x1xf32>
    %110 = arith.addf %106, %109 : vector<8x3x1xf32>
    %111 = math.rsqrt %110 : vector<8x3x1xf32>
    %112 = vector.broadcast %111 : vector<8x3x1xf32> to vector<8x3x32xf32>
    %113 = arith.mulf %108, %112 : vector<8x3x32xf32>
    %114 = vector.shape_cast %113 : vector<8x3x32xf32> to vector<8x96xf32>
    %115 = vector.broadcast %93 : vector<1x96xf32> to vector<8x96xf32>
    %116 = arith.mulf %114, %115 : vector<8x96xf32>
    %117 = vector.broadcast %94 : vector<1x96xf32> to vector<8x96xf32>
    %118 = arith.addf %116, %117 : vector<8x96xf32>
    %c0_75 = arith.constant 0 : index
    %c0_76 = arith.constant 0 : index
    %119 = vector.load %arg14[%c0_75, %c0_76] : memref<1x96xf32, #tpu.memory_space<vmem>>, vector<1x96xf32>
    %120 = vector.broadcast %119 : vector<1x96xf32> to vector<8x96xf32>
    %121 = arith.mulf %118, %120 : vector<8x96xf32>
    %122 = vector.shape_cast %121 : vector<8x96xf32> to vector<8x3x32xf32>
    %cst_77 = arith.constant dense<0.000000e+00> : vector<8x3xf32>
    %123 = vector.multi_reduction <add>, %122, %cst_77 [2] : vector<8x3x32xf32> to vector<8x3xf32>
    %c0_78 = arith.constant 0 : index
    %c0_79 = arith.constant 0 : index
    %124 = vector.load %arg15[%c0_78, %c0_79] : memref<1x3xf32, #tpu.memory_space<vmem>>, vector<1x3xf32>
    %125 = vector.broadcast %124 : vector<1x3xf32> to vector<8x3xf32>
    %126 = arith.addf %123, %125 : vector<8x3xf32>
    %cst_80 = arith.constant 1.000000e+00 : f32
    %127 = vector.broadcast %cst_80 : f32 to vector<8x1xf32>
    %128 = arith.subf %127, %3 : vector<8x1xf32>
    %129 = vector.broadcast %128 : vector<8x1xf32> to vector<8x3xf32>
    %130 = arith.mulf %126, %129 : vector<8x3xf32>
    %c0_81 = arith.constant 0 : index
    %c0_82 = arith.constant 0 : index
    %c0_83 = arith.constant 0 : index
    %131 = vector.load %arg16[%c0_81, %c0_82, %c0_83] : memref<1x8x3xf32, #tpu.memory_space<vmem>>, vector<1x8x3xf32>
    %132 = vector.shape_cast %131 : vector<1x8x3xf32> to vector<8x3xf32>
    %133 = vector.shape_cast %130 : vector<8x3xf32> to vector<1x8x3xf32>
    tpu.vector_store %arg16[%c0_81, %c0_82, %c0_83], %133 {strides = array<i32>} : memref<1x8x3xf32, #tpu.memory_space<vmem>>, vector<1x8x3xf32>,
    return
  }
  func.func @transform_0(%arg0: i32) -> (i32, i32, i32) {
    %c0_i32 = arith.constant 0 : i32
    %c0_i32_0 = arith.constant 0 : i32
    %c0_i32_1 = arith.constant 0 : i32
    return %arg0, %c0_i32, %c0_i32_0 : i32, i32, i32
  }
  func.func @transform_1(%arg0: i32) -> (i32, i32, i32) {
    %c0_i32 = arith.constant 0 : i32
    %c0_i32_0 = arith.constant 0 : i32
    %c0_i32_1 = arith.constant 0 : i32
    return %arg0, %c0_i32, %c0_i32_0 : i32, i32, i32
  }
  func.func @transform_2(%arg0: i32) -> (i32, i32, i32) {
    %c0_i32 = arith.constant 0 : i32
    %c0_i32_0 = arith.constant 0 : i32
    %c0_i32_1 = arith.constant 0 : i32
    return %arg0, %c0_i32, %c0_i32_0 : i32, i32, i32
  }
  func.func @transform_3(%arg0: i32) -> (i32, i32) {
    %c0_i32 = arith.constant 0 : i32
    %c0_i32_0 = arith.constant 0 : i32
    %c0_i32_1 = arith.constant 0 : i32
    return %c0_i32, %c0_i32_0 : i32, i32
  }
  func.func @transform_4(%arg0: i32) -> (i32, i32) {
    %c0_i32 = arith.constant 0 : i32
    %c0_i32_0 = arith.constant 0 : i32
    %c0_i32_1 = arith.constant 0 : i32
    return %c0_i32, %c0_i32_0 : i32, i32
  }
  func.func @transform_5(%arg0: i32) -> (i32, i32) {
    %c0_i32 = arith.constant 0 : i32
    %c0_i32_0 = arith.constant 0 : i32
    %c0_i32_1 = arith.constant 0 : i32
    return %c0_i32, %c0_i32_0 : i32, i32
  }
  func.func @transform_6(%arg0: i32) -> (i32, i32) {
    %c0_i32 = arith.constant 0 : i32
    %c0_i32_0 = arith.constant 0 : i32
    %c0_i32_1 = arith.constant 0 : i32
    return %c0_i32, %c0_i32_0 : i32, i32
  }
  func.func @transform_7(%arg0: i32) -> (i32, i32) {
    %c0_i32 = arith.constant 0 : i32
    %c0_i32_0 = arith.constant 0 : i32
    %c0_i32_1 = arith.constant 0 : i32
    return %c0_i32, %c0_i32_0 : i32, i32
  }
  func.func @transform_8(%arg0: i32) -> (i32, i32) {
    %c0_i32 = arith.constant 0 : i32
    %c0_i32_0 = arith.constant 0 : i32
    %c0_i32_1 = arith.constant 0 : i32
    return %c0_i32, %c0_i32_0 : i32, i32
  }
  func.func @transform_9(%arg0: i32) -> (i32, i32) {
    %c0_i32 = arith.constant 0 : i32
    %c0_i32_0 = arith.constant 0 : i32
    %c0_i32_1 = arith.constant 0 : i32
    return %c0_i32, %c0_i32_0 : i32, i32
  }
  func.func @transform_10(%arg0: i32) -> (i32, i32) {
    %c0_i32 = arith.constant 0 : i32
    %c0_i32_0 = arith.constant 0 : i32
    %c0_i32_1 = arith.constant 0 : i32
    return %c0_i32, %c0_i32_0 : i32, i32
  }
  func.func @transform_11(%arg0: i32) -> (i32, i32) {
    %c0_i32 = arith.constant 0 : i32
    %c0_i32_0 = arith.constant 0 : i32
    %c0_i32_1 = arith.constant 0 : i32
    return %c0_i32, %c0_i32_0 : i32, i32
  }
  func.func @transform_12(%arg0: i32) -> (i32, i32) {
    %c0_i32 = arith.constant 0 : i32
    %c0_i32_0 = arith.constant 0 : i32
    %c0_i32_1 = arith.constant 0 : i32
    return %c0_i32, %c0_i32_0 : i32, i32
  }
  func.func @transform_13(%arg0: i32) -> (i32, i32) {
    %c0_i32 = arith.constant 0 : i32
    %c0_i32_0 = arith.constant 0 : i32
    %c0_i32_1 = arith.constant 0 : i32
    return %c0_i32, %c0_i32_0 : i32, i32
  }
  func.func @transform_14(%arg0: i32) -> (i32, i32) {
    %c0_i32 = arith.constant 0 : i32
    %c0_i32_0 = arith.constant 0 : i32
    %c0_i32_1 = arith.constant 0 : i32
    return %c0_i32, %c0_i32_0 : i32, i32
  }
  func.func @transform_15(%arg0: i32) -> (i32, i32, i32) {
    %c0_i32 = arith.constant 0 : i32
    %c0_i32_0 = arith.constant 0 : i32
    %c0_i32_1 = arith.constant 0 : i32
    return %arg0, %c0_i32, %c0_i32_0 : i32, i32, i32
  }
  func.func @transform_16(%arg0: i32) -> (i32, i32, i32) {
    %c0_i32 = arith.constant 0 : i32
    %c0_i32_0 = arith.constant 0 : i32
    %c0_i32_1 = arith.constant 0 : i32
    return %arg0, %c0_i32, %c0_i32_0 : i32, i32, i32
  }
}

</mosaic_0001>

<bundles_post_ra>
// kernel: variance_adaptor_forward.3
= control target key start
LH: loop header
LB: loop body
LE: loop exit
PB: predicated region body
PF: predicated region fallthrough
CT: control target
= control target key end

     0   :  { %7 = vsyncpa [#allocation3], 0  ;;  %s655_s0 = inlined_call_operand.vmem [shape: f32[2,8,32], index: 0, kind: input, shape index: {}]   ;;  %s656_s1 = inlined_call_operand.vmem [shape: s32[2,8], index: 1, kind: input, shape index: {}]   ;;  %s657_s2 = inlined_call_operand.hbm [shape: f32[2,16,32], index: 2, kind: output, shape index: {}]  }
   0x1   :  { %9 = vsyncpa [#allocation3 + $0x1], 0  ;;  %s542_s9 = smov 0   ;;  %s544_s10 = smov 0  }
   0x2   :  { %s546_s11 = smov 0   ;;  %s548_s12 = smov 0  }
   0x3 LB: > { %s563_s13 = sadd.s32 4294967295, %s518_s12   ;;  %s386_s14 = sadd.s32 4294967294, %s518_s12   ;;  %s518_s12 = sphi %s548_s12, %s663_s12   ;;  %s514_s11 = sphi %s546_s11, %s662_s11   ;;  %s510_s10 = sphi %s544_s10, %s661_s10   ;;  %s506_s9 = sphi %s542_s9, %s660_s9  }
   0x4   : > { %s567_s15 = sadd.s32 1, %s518_s12   ;;  %s64_s16 = sadd.s32 1, %s514_s11 }
   0x5   : > { %s61_s17 = ssub.s32 %s518_s12, %s567_s15  ;;  %p74_p0 = scmp.ne.s32.totalorder %s514_s11, %s510_s10 }
   0x6   : > { %p62_p1 = scmp.eq.s32.totalorder %s61_s17, 0  ;;  %p75_p2 = scmp.eq.s32.totalorder %s563_s13, 1 }
   0x7   : > { %p80_p3 = scmp.ne.s32.totalorder %s510_s10, %s506_s9  ;;  %p81_p4 = scmp.eq.s32.totalorder %s386_s14, 1 }
   0x8   : > { %s578_s18 = scalar_select %p62_p1, %s514_s11, %s64_s16  }
   0x9   : > { %p580_p5 = por %p75_p2, %p74_p0  ;;  %p584_p6 = por %p81_p4, %p80_p3 }
   0xa   : > { %p388_p7 = scmp.ge.s32.totalorder %s518_s12, 1  ;;  %p105_p8 = scmp.lt.s32.totalorder %s518_s12, 3 }
   0xc   : > { %p106_p9 = pnand %p388_p7, %p105_p8 }
   0xd   : > { %s390_s21 = sshll.u32 (!%p106_p9), %s563_s13, 3  ;;  %s119_s28 = sand.u32 (!%p106_p9), 1, %s510_s10  }
   0xe   : > { %109 = sbr.rel (%p106_p9) target bundleno = 760 (0x2f8), region = 28  ;;  %s389_s29 = sshll.u32 (!%p106_p9), %s119_s28, 4 }
   0xf   : > { %s121_s30 = scalar_lea.vmem (!%p106_p9), [#allocation2], %s389_s29  ;;  %s397_s4 = sshll.u32 (!%p106_p9), %s563_s13, 7 }
  0x10   : > { %s336_s3 = sshll.u32 (!%p106_p9), %s121_s30, 4  ;;  %s613_s7 = scalar_lea.hbm (!%p106_p9), %s657_s2, %s397_s4  ;;  %s608_s3 = int_to_ptr.vmem [resolvable:$true] %s336_s3 }
  0x11   : > { %s615_s8 = scalar_lea.sflag (!%p106_p9), [#allocation3], %s119_s28  ;;  %s458_s14 = scalar_lea.vmem (!%p106_p9), %s608_s3, 256 }
  0x12   : > { %p459_p10 = scmp.ne.s32.totalorder (!%p106_p9), %s608_s3, %s458_s14  ;;  %s523_s13 = smov (!%p106_p9), [#allocation2]  }
  0x13   : > { %v124_v0 = vlaneseq  ;;  %v126_v1 = vstv %s390_s21  ;;  %v520_v2 = vmov 0   ;;  %v521_v5 = vmov 1966171168   ;;  %v237_v51 = vld [vmem:[%s655_s0 + $0x8] sm:$0xff]  ;;  %v236_v54 = vld [vmem:[%s655_s0] sm:$0xff]  ;;  %s462_s16 = sshll.u32 %s523_s13, 4  ;;  %s463_s16 = int_to_ptr.vmem [resolvable:$false] %s462_s16 }
  0x14   : > { %456 = vset.pattern.permute.xlu1 %v520_v2  ;;  %457 = vset.pattern.permute.xlu0 %v520_v2  ;;  %v137_v6 = vunpack.c.l.s4 %v521_v5  ;;  %v391_v9 = vld.sshfl [vmem:[%s656_s1] sm:$0x11 pattern:$0x75316420]  ;;  %vm165_vm0 = vcmask 64512   ;;  %vm205_vm3 = vcmask 1041409   ;;  %p460_p11 = pnand %p459_p10, %p580_p5  ;;  %p465_p13 = scmp.lt.s32.totalorder %s608_s3, %s463_s16 }
  0x15   : > { %v591_v3 = vand.u32 127, %v124_v0  ;;  %v140_v7 = vshrl.u32 %v124_v0, 7  ;;  %v135_v10 = vcombine.high %v391_v9, %v391_v9  ;;  %404 = vmatprep.subr.mxu0 %v237_v51  ;;  %vm238_vm6 = vcmask 130048   ;;  %s464_s17 = scalar_lea.vmem %s463_s16, 512 }
  0x16   : > { %v138_v8 = vunpack.c.0.s8 %v137_v6  ;;  %405 = vmatpush3.msra.mxu0 %v237_v51  ;;  %v522_v58 = vmov 0.0   ;;  %vm320_vm9 = vcmask 261120   ;;  %p461_p12 = pneg %p460_p11  ;;  %p466_p0 = scmp.lt.s32.totalorder %s464_s17, %s458_s14 }
  0x17   : > { %v127_v4 = vadd.s32 %v126_v1, %v591_v3  ;;  %v155_v14 = vsub.s32 0, %v140_v7  ;;  %v199_v39 = vsub.s32 %v591_v3, %v140_v7  ;;  %v196_v43 = vmul.u32 8, %v140_v7  ;;  %406 = vmatprep.subr.mxu0 %v236_v54 }
  0x18   : > { %v141_v11 = vsub.s32 %v138_v8, %v140_v7  ;;  %v217_v49 = vsub.s32 1, %v140_v7  ;;  %407 = vmatpush3.msra.mxu0 %v236_v54  ;;  %p467_p1 = por %p466_p0, %p465_p13 }
  0x19   : > { %151 = vbcast.lane.b32.xlu0 %v127_v4, 256 }
  0x1a   : > { %v142_v12 = vrot.slane %v391_v9, %v141_v11  ;;  %v149_v13 = vrot.slane %v135_v10, %v141_v11  ;;  %p468_p2 = pnand %p467_p1, %p461_p12 }
  0x1c   : > { %v156_v15 = vrot.slane %v142_v12, %v155_v14  ;;  %v160_v16 = vrot.slane %v149_v13, %v155_v14 }
  0x8b   : > { %v152_v17 = vpop.permute.xlu0 %151 }
  0x8c   : > { %vm161_vm1 = vcmp.le.s32.totalorder %v156_v15, %v152_v17  ;;  %vm162_vm2 = vcmp.le.s32.totalorder %v160_v16, %v152_v17 }
  0x8d   : > { %v163_v18 = vsel %vm161_vm1, 1, %v520_v2  ;;  %v164_v19 = vsel %vm162_vm2, 1, %v520_v2 }
  0x8e   : > { %v179_v20 = vsel %vm165_vm0, %v164_v19, 0  ;;  %v166_v21 = vsel %vm165_vm0, %v163_v18, 0 }
  0x8f   : > { %v181_v22 = vshrl.u32 %v179_v20, 16  ;;  %v168_v23 = vshrl.u32 %v166_v21, 16  ;;  %v167_v26 = vand.u32 65535, %v166_v21  ;;  %v180_v28 = vand.u32 65535, %v179_v20 }
  0x91   : > { %v183_v24 = vcvt.s32.f32 %v181_v22  ;;  %v170_v25 = vcvt.s32.f32 %v168_v23  ;;  %v169_v27 = vcvt.s32.f32 %v167_v26  ;;  %v182_v29 = vcvt.s32.f32 %v180_v28 }
  0x93   : > { %186 = vadd.xlane.f32.xlu1 %v183_v24  ;;  %173 = vadd.xlane.f32.xlu0 %v170_v25 }
  0x97   : > { %171 = vadd.xlane.f32.xlu1 %v169_v27 }
  0x9b   : > { %184 = vadd.xlane.f32.xlu1 %v182_v29 }
 0x11c   : > { %v187_v30 = vpop.xlane.xlu1 %186  ;;  %v174_v31 = vpop.xlane.xlu0 %173 }
 0x11d   : > { %v176_v32 = vcvt.f32.s32 %v174_v31  ;;  %v189_v34 = vcvt.f32.s32 %v187_v30 }
 0x11f   : > { %v177_v36 = vshll.u32 %v176_v32, 16  ;;  %v190_v38 = vshll.u32 %v189_v34, 16 }
 0x120   : > { %v172_v33 = vpop.xlane.xlu1 %171 }
 0x121   : > { %v175_v35 = vcvt.f32.s32 %v172_v33 }
 0x123   : > { %v178_v40 = vadd.s32 %v177_v36, %v175_v35 }
 0x124   : > { %v185_v37 = vpop.xlane.xlu1 %184 }
 0x125   : > { %v188_v41 = vcvt.f32.s32 %v185_v37  ;;  %v200_v44 = vrot.slane %v178_v40, %v199_v39  ;;  %vm194_vm4 = vcmp.lt.s32.totalorder %v178_v40, 8 }
 0x127   : > { %v191_v42 = vadd.s32 %v190_v38, %v188_v41 }
 0x129   : > { %v204_v45 = vrot.slane %v191_v42, %v199_v39  ;;  %vm195_vm5 = vcmp.lt.s32.totalorder %v191_v42, 8 }
 0x12b   : > { %v206_v46 = vsel %vm205_vm3, %v204_v45, %v200_v44 }
 0x12c   : > { %v207_v47 = vadd.s32 %v206_v46, %v196_v43 }
 0x12e   : > { %v211_v48 = vrot.slane %v207_v47, %v155_v14  ;;  %v218_v50 = vrot.slane %v207_v47, %v217_v49 }
 0x130   : > { %213 = vbcast.lane.b32.xlu1 %v211_v48, 256 }
 0x134   : > { %220 = vbcast.lane.b32.xlu1 %v218_v50, 256 }
 0x1a2   : > { %v214_v52 = vpop.permute.xlu1 %213 }
 0x1a3   : > { %v222_v53 = vsel %vm194_vm4, %v214_v52, 4294967295 }
 0x1a4   : > { %225 = vperm.xlu1 %456, %v222_v53  }
 0x1a6   : > { %v221_v55 = vpop.permute.xlu1 %220 }
 0x1a7   : > { %v223_v56 = vsel %vm195_vm5, %v221_v55, 4294967295 }
 0x1a8   : > { %228 = vperm.xlu0 %457, %v223_v56  }
 0x21f   : > { %v226_v57 = vpop.permute.xlu1 %225 }
 0x220   : > { %vm230_vm7 = vcmp.eq.s32.totalorder %v591_v3, %v226_v57 }
 0x221   : > { %v392_v59 = vsel %vm230_vm7, 1.0, %v522_v58 }
 0x222   : > { %408 = vmatprep.mubr.msk.f32.mxu0 %vm238_vm6, %v392_v59 }
 0x223   : > { %v229_v60 = vpop.permute.xlu0 %228 }
 0x224   : > { %vm231_vm8 = vcmp.eq.s32.totalorder %v591_v3, %v229_v60 }
 0x225   : > { %v393_v61 = vsel %vm231_vm8, 1.0, %v522_v58 }
 0x226   : > { %409 = vmatmul.mubr.msk.f32.vlgmr.msra.gmra.mxu0 %vm238_vm6, %v393_v61 }
 0x2e6   : > { %v410_v62 = vpop.f32.mrf.mxu0 }
 0x2e7   : > { %322 = vst.msk [vmem:[%s121_s30 + $0x8] sm:$0xff] %vm320_vm9, %v410_v62 }
 0x2e8   : > { %v311_v63 = vpop.f32.mrf.mxu0 }
 0x2e9   : > { %321 = vst.msk [vmem:[%s121_s30] sm:$0xff] %vm320_vm9, %v311_v63 }
 0x2ea   : > { %471 = shalt.err (!%p468_p2)
}
 0x2eb   : > { %s472_s21 = scalar_lea.hbm %s613_s7, 256  ;;  %s476_s24 = scalar_lea.hbm %s657_s2, 512 }
 0x2ec   : > { %p473_p3 = scmp.ne.s32.totalorder %s613_s7, %s472_s21  ;;  %p477_p8 = scmp.lt.s32.totalorder %s613_s7, %s657_s2 }
 0x2ed   : > { %p478_p9 = scmp.lt.s32.totalorder %s476_s24, %s472_s21 }
 0x2ee   : > { %p474_p4 = pnand %p473_p3, %p580_p5 }
 0x2ef   : > { %p479_p10 = por %p478_p9, %p477_p8 }
 0x2f0   : > { %p475_p7 = pneg %p474_p4 }
 0x2f2   : > { %p480_p11 = pnand %p479_p10, %p475_p7 }
 0x2f4   : > { %483 = shalt.err (!%p480_p11)
}
 0x2f5   : > { %s524_s27 = smov 128   ;;  %s525_s28 = smov 256  }
 0x2f6   : > { %s526_s29 = smov 8  }
 0x2f7   : > { %411 = dma.vmem_to_hbm [thread:$0]  (%p580_p5), %s608_s3, 256, %s613_s7, %s615_s8, %s524_s27, %s525_s28, %s526_s29  }
 0x2f8 PF: > { %p417_p12 = scmp.ge.s32.totalorder %s518_s12, 2  ;;  %s351_s30 = sand.u32 1, %s506_s9  }
 0x2f9   : > { %s352_s4 = scalar_lea.sflag [#allocation3], %s351_s30 }
 0x2fa   : > { %p414_p13 = pnand %p417_p12, %p584_p6 }
 0x2fc   : > { %p415_p0 = pneg %p414_p13 }
 0x2fe   : > { %501 = dma.done.wait (%p415_p0), %s352_s4, 256  }
 0x2ff   : > { %503 = vsyncadd (%p415_p0), %s352_s4, 4294967040  ;;  %p12_p1 = scmp.ge.s32.totalorder %s567_s15, 4   ;;  %s660_s9 = smov %s510_s10 }
 0x300   : > { %s661_s10 = smov %s514_s11  ;;  %s662_s11 = smov %s578_s18 }
 0x301   : > { %s663_s12 = smov %s567_s15  ;;  %14 = sbr.rel (!%p12_p1) target bundleno = 3 (0x3), region = 60 }
 0x306   :  { %357 = vsyncpa [#allocation3], 1 }
 0x307   :  { %359 = vsyncpa [#allocation3 + $0x1], 1 }

// kernel: variance_adaptor_forward.2
= control target key start
LH: loop header
LB: loop body
LE: loop exit
PB: predicated region body
PF: predicated region fallthrough
CT: control target
= control target key end

     0   :  { %s2801_s0 = inlined_call_operand.vmem [shape: f32[2,8,32], index: 0, kind: input, shape index: {}]   ;;  %s2802_s1 = inlined_call_operand.vmem [shape: f32[2,8,1], index: 1, kind: input, shape index: {}]   ;;  %s2803_s2 = inlined_call_operand.vmem [shape: f32[2,8,1], index: 2, kind: input, shape index: {}]   ;;  %s2804_s3 = inlined_call_operand.vmem [shape: f32[1,31], index: 3, kind: input, shape index: {}]   ;;  %s2805_s4 = inlined_call_operand.vmem [shape: bf16[32,32], index: 4, kind: input, shape index: {}]   ;;  %s2806_s5 = inlined_call_operand.hbm [shape: bf16[192,96], index: 5, kind: input, shape index: {}]   ;;  %s2807_s6 = inlined_call_operand.vmem [shape: f32[1,96], index: 6, kind: input, shape index: {}]   ;;  %s2808_s7 = inlined_call_operand.vmem [shape: f32[1,96], index: 7, kind: input, shape index: {}]   ;;  %s2809_s8 = inlined_call_operand.vmem [shape: f32[1,96], index: 8, kind: input, shape index: {}]   ;;  %s2810_s9 = inlined_call_operand.hbm [shape: bf16[288,96], index: 9, kind: input, shape index: {}]   ;;  %s2811_s10 = inlined_call_operand.vmem [shape: f32[1,96], index: 10, kind: input, shape index: {}]   ;;  %s2812_s11 = inlined_call_operand.vmem [shape: f32[1,96], index: 11, kind: input, shape index: {}]   ;;  %s2813_s12 = inlined_call_operand.vmem [shape: f32[1,96], index: 12, kind: input, shape index: {}]   ;;  %s2814_s13 = inlined_call_operand.vmem [shape: f32[1,96], index: 13, kind: input, shape index: {}]   ;;  %s2815_s14 = inlined_call_operand.vmem [shape: f32[1,3], index: 14, kind: input, shape index: {}]   ;;  %s2816_s15 = inlined_call_operand.vmem [shape: f32[2,8,3], index: 15, kind: output, shape index: {0}]   ;;  %s2817_s16 = inlined_call_operand.vmem [shape: f32[2,8,32], index: 16, kind: output, shape index: {1}]  }
   0x1   :  { %2818 = sst [smem:[#allocation9_spill]] %s2801_s0 }
   0x2   :  { %22 = vsyncpa [#allocation4], 0 }
   0x3   :  { %23 = vsyncpa [#allocation6], 0  ;;  %s2454_s21 = smov 0  }
   0x4 LB: > { %s2460_s22 = sadd.s32 4294967295, %s2355_s21   ;;  %p2081_p0 = scmp.ge.s32.totalorder %s2355_s21, 1  ;;  %s2355_s21 = sphi %s2454_s21, %s29_s21  }
   0x5   : > { %p416_p1 = scmp.lt.s32.totalorder %s2355_s21, 3  ;;  %s2357_s23 = smov [#allocation3]  }
   0x6   : > { %s434_s24 = sshll.u32 %s2357_s23, 4  ;;  %p2199_p3 = scmp.eq.s32.totalorder %s2460_s22, 0  ;;  %s435_s24 = int_to_ptr.vmem [resolvable:$true] %s434_s24 }
   0x7   : > { %p2464_p2 = pnand %p2081_p0, %p416_p1  ;;  %s2358_s26 = smov [#allocation5]  }
   0x8   : > { %s456_s27 = sshll.u32 %s2358_s26, 4  ;;  %s2300_s29 = scalar_lea.vmem %s435_s24, 1536  ;;  %s457_s27 = int_to_ptr.vmem [resolvable:$true] %s456_s27 }
   0x9   : > { %p2192_p4 = pneg %p2464_p2  ;;  %p2301_p7 = scmp.ne.s32.totalorder %s435_s24, %s2300_s29 }
   0xa   : > { %p2308_p10 = scmp.lt.s32.totalorder %s435_s24, %s435_s24  ;;  %p2309_p11 = scmp.lt.s32.totalorder %s2300_s29, %s2300_s29 }
   0xb   : > { %p2473_p5 = pnand %p2199_p3, %p2192_p4 }
   0xc   : > { %p2310_p12 = por %p2309_p11, %p2308_p10 }
   0xd   : > { %p2291_p6 = pneg %p2473_p5 }
   0xf   : > { %p2303_p8 = pnand %p2301_p7, %p2291_p6 }
  0x11   : > { %p2304_p9 = pneg %p2303_p8 }
  0x13   : > { %p2311_p13 = pnand %p2310_p12, %p2304_p9 }
  0x15   : > { %2314 = shalt.err (!%p2311_p13)
}
  0x16   : > { %s2359_s30 = smov 64   ;;  %s2360_s0 = smov 4  }
  0x17   : > { %2195 = dma.hbm_to_vmem [thread:$0]  (!%p2473_p5), %s2806_s5, 1536, %s435_s24, [#allocation4], %s2359_s30, %s2359_s30, %s2360_s0  }
  0x18   : > { %s2326_s19 = scalar_lea.vmem %s457_s27, 2304  ;;  %p2334_p7 = scmp.lt.s32.totalorder %s457_s27, %s457_s27 }
  0x19   : > { %p2327_p0 = scmp.ne.s32.totalorder %s457_s27, %s2326_s19  ;;  %p2335_p8 = scmp.lt.s32.totalorder %s2326_s19, %s2326_s19 }
  0x1b   : > { %p2329_p1 = pnand %p2327_p0, %p2291_p6  ;;  %p2336_p10 = por %p2335_p8, %p2334_p7 }
  0x1d   : > { %p2330_p4 = pneg %p2329_p1 }
  0x1f   : > { %p2337_p9 = pnand %p2336_p10, %p2330_p4 }
  0x21   : > { %2340 = shalt.err (!%p2337_p9)
}
  0x22   : > { %2198 = dma.hbm_to_vmem [thread:$0]  (!%p2473_p5), %s2810_s9, 2304, %s457_s27, [#allocation6], %s2359_s30, %s2359_s30, %s2360_s0  }
  0x23   : > { %508 = sbr.rel (%p2464_p2) target bundleno = 2770 (0xad2), region = 80 }
  0x28   : > { %2346 = dma.done.wait (%p2199_p3), [#allocation4], 1536  }
  0x29   : > { %2348 = vsyncadd (%p2199_p3), [#allocation4], 4294965760 }
  0x2a   : > { %2350 = dma.done.wait (%p2199_p3), [#allocation6], 2304  }
  0x2b   : > { %2352 = vsyncadd (%p2199_p3), [#allocation6], 4294964992  ;;  %p572_p6 = scmp.lt.s32.totalorder %s2460_s22, 1  ;;  %v2361_v0 = vmov 0   ;;  %v2093_v2 = vld [vmem:[%s2804_s3] ss:$0 sm:$0xff]  ;;  %v624_v14 = vlaneseq }
  0x2c   : > { %2223 = vset.pattern.permute.xlu0 %v2361_v0  ;;  %841 = vmatprep.subr.bf16.mxu1 %v2361_v0  ;;  %vm610_vm0 = vcmask 252928   ;;  %v2225_v10 = vld [vmem:[%s2805_s4 + $0x8] sm:$0xff]   ;;  %v2362_v11 = vmov 0.0   ;;  %v2226_v12 = vld [vmem:[%s2805_s4] sm:$0xff]   ;;  %vm2363_vm2 = vmmov 0   ;;  %s2821_s20 = sld [smem:[#allocation9_spill]] }
  0x2d   : > { %s2823_s22 = smov (!%p572_p6, %s2460_s22), 1  ;;  %2224 = vset.pattern.permute.xlu1 %v2361_v0  ;;  %2168 = vmatprep.subr.bf16.mxu0 %v2362_v11  ;;  %s2364_s25 = smov 32   ;;  %v2539_v19 = vand.u32 127, %v624_v14  ;;  %vm646_vm4 = vcmask 261120   ;;  %v2227_v26 = vld [vmem:[#allocation3 + $0x38] sm:$0xff]   ;;  %vm692_vm5 = vcmask 253952  }
  0x2e   : > { %s2510_s24 = sshll.u32 %s2823_s22, 3  ;;  %2169 = vmatpush3.bf16.msra.mxu0 %v2225_v10  ;;  %2172 = vmatprep.mubr.msk.bf16.mxu0 %vm2363_vm2, %v2362_v11  ;;  %s2365_s26 = smov 64   ;;  %vm697_vm6 = vcmask 261121   ;;  %vm702_vm7 = vcmask 523520   ;;  %693 = vst.msk [vmem:[#allocation2] sm:$0x1] %vm692_vm5, %v2362_v11 }
  0x2f   : > { %s583_s27 = scalar_lea.vmem %s2803_s2, %s2510_s24  ;;  %2170 = vmatprep.subr.bf16.mxu0 %v2362_v11  ;;  %vm710_vm8 = vcmask 778752   ;;  %1178 = vst.msk [vmem:[#allocation2 + $0x17] sm:$0x1] %vm692_vm5, %v2362_v11  ;;  %842 = vmatpush1.bf16.msra.mxu1 %v2227_v26  ;;  %v2228_v28 = vld [vmem:[#allocation3 + $0x30] sm:$0xff]   ;;  %v2229_v29 = vld [vmem:[#allocation3 + $0x28] sm:$0xff]   ;;  %v2230_v30 = vld [vmem:[#allocation3 + $0x20] sm:$0xff]   ;;  %s591_s29 = scalar_lea.vmem %s2817_s16, %s2510_s24 }
  0x30   : > { %v595_v1 = vld [vmem:[%s583_s27] sm:$0xff]  ;;  %843 = vmatprep.subr.bf16.mxu1 %v2361_v0  ;;  %v2231_v31 = vld [vmem:[#allocation3 + $0x18] sm:$0xff]   ;;  %v2232_v32 = vld [vmem:[#allocation3 + $0x10] sm:$0xff]   ;;  %vm708_vm9 = vcmask 784896   ;;  %vm712_vm10 = vcmask 1041152   ;;  %vm728_vm11 = vcmask 516352   ;;  %s587_s28 = scalar_lea.vmem %s2816_s15, %s2510_s24 }
  0x31   : > { %605 = vperm.xlu0 %2223, %v595_v1   ;;  %v2233_v33 = vld [vmem:[#allocation3 + $0x8] sm:$0xff]   ;;  %v2234_v34 = vld [vmem:[#allocation3] sm:$0xff]   ;;  %v2235_v35 = vld [vmem:[#allocation3 + $0x58] sm:$0xff]   ;;  %s2366_s22 = smov 96   ;;  %vm726_vm12 = vcmask 522496   ;;  %vm719_vm13 = vcmask 1048321  }
  0x32   : > { %2171 = vmatpush3.bf16.msra.mxu0 %v2226_v12  ;;  %s575_s23 = scalar_lea.vmem %s2821_s20, %s2510_s24  ;;  %v2236_v37 = vld [vmem:[#allocation3 + $0x50] sm:$0xff]   ;;  %v2237_v38 = vld [vmem:[#allocation3 + $0x48] sm:$0xff]   ;;  %v2238_v41 = vld [vmem:[#allocation3 + $0x40] sm:$0xff]   ;;  %vm837_vm14 = vcmask 523264   ;;  %vm1155_vm15 = vcmask 778240   ;;  %v2580_v1 = vshrl.u32 %v624_v14, 7 }
  0x33   : > { %v2534_v13 = vld [vmem:[%s575_s23] sm:$0xff]  ;;  %844 = vmatpush1.bf16.msra.mxu1 %v2228_v28  ;;  %v2367_v60 = vmov 1983009808   ;;  %v2368_v62 = vmov 1934713408   ;;  %vm1176_vm5 = vcmask 1040896  }
  0x34   : > { %v704_v24 = vrot.slane %v2534_v13, 1  ;;  %v695_v25 = vrot.slane %v2534_v13, 7  ;;  %845 = vmatprep.subr.bf16.mxu1 %v2361_v0  ;;  %v2098_v53 = vld [vmem:[%s2807_s6] ss:$0 sm:$0xff]  ;;  %v894_v61 = vunpack.c.l.s4 %v2367_v60  ;;  %v925_v63 = vunpack.c.l.s4 %v2368_v62 }
  0x36   : > { %698 = vst.msk [vmem:[#allocation2] sm:$0xfe] %vm697_vm6, %v695_v25  ;;  %vm1172_vm6 = vcmask 1047040  }
  0x37   : > { %846 = vmatpush1.bf16.msra.mxu1 %v2229_v29 }
  0x38   : > { %847 = vmatprep.subr.bf16.mxu1 %v2361_v0 }
  0x3b   : > { %848 = vmatpush1.bf16.msra.mxu1 %v2230_v30 }
  0x3c   : > { %849 = vmatprep.subr.bf16.mxu1 %v2361_v0 }
  0x3f   : > { %850 = vmatpush1.bf16.msra.mxu1 %v2231_v31 }
  0x40   : > { %851 = vmatprep.subr.bf16.mxu1 %v2361_v0 }
  0x43   : > { %852 = vmatpush1.bf16.msra.mxu1 %v2232_v32 }
  0x44   : > { %853 = vmatprep.subr.bf16.mxu1 %v2361_v0 }
  0x47   : > { %854 = vmatpush1.bf16.msra.mxu1 %v2233_v33 }
  0x48   : > { %855 = vmatprep.subr.bf16.mxu1 %v2361_v0 }
  0x4b   : > { %856 = vmatpush1.bf16.msra.mxu1 %v2234_v34 }
  0x4c   : > { %865 = vmatprep.subr.bf16.mxu1 %v2361_v0 }
  0x4f   : > { %866 = vmatpush2.bf16.msra.mxu1 %v2235_v35 }
  0x50   : > { %867 = vmatprep.subr.bf16.mxu1 %v2361_v0 }
  0x53   : > { %868 = vmatpush2.bf16.msra.mxu1 %v2236_v37 }
  0x54   : > { %869 = vmatprep.subr.bf16.mxu1 %v2361_v0 }
  0x57   : > { %870 = vmatpush2.bf16.msra.mxu1 %v2237_v38 }
  0x58   : > { %871 = vmatprep.subr.bf16.mxu1 %v2361_v0 }
  0x5b   : > { %872 = vmatpush2.bf16.msra.mxu1 %v2238_v41 }
  0xac   : > { %v606_v3 = vpop.permute.xlu0 %605 }
  0xad   : > { %vm608_vm1 = vcmp.lt.f32.partialorder %v2093_v2, %v606_v3  ;;  %v926_v2 = vunpack.c.0.s8 %v925_v63 }
  0xae   : > { %v609_v4 = vsel %vm608_vm1, 1, %v2361_v0  ;;  %v895_v0 = vunpack.c.0.s8 %v894_v61  ;;  %vm1160_vm1 = vcmask 785409  }
  0xaf   : > { %v611_v5 = vsel %vm610_vm0, %v609_v4, 0  ;;  %vm958_vm0 = vcmask 256000  }
  0xb0   : > { %v613_v6 = vshrl.u32 %v611_v5, 16  ;;  %v612_v7 = vand.u32 65535, %v611_v5  ;;  %v2583_v3 = vsub.s32 %v895_v0, %v2580_v1 }
  0xb2   : > { %v615_v8 = vcvt.s32.f32 %v613_v6  ;;  %v614_v9 = vcvt.s32.f32 %v612_v7 }
  0xb4   : > { %618 = vadd.xlane.f32.xlu0 %v615_v8  ;;  %616 = vadd.xlane.f32.xlu1 %v614_v9  ;;  %v2587_v9 = vsub.s32 %v926_v2, %v2580_v1 }
  0xc5   : > { %699 = vrot.lane.b32.xlu1 %v2534_v13, %s2364_s25 }
  0xc9   : > { %705 = vrot.lane.b32.xlu1 %v704_v24, %s2365_s26 }
 0x13d   : > { %v619_v15 = vpop.xlane.xlu0 %618  ;;  %v617_v16 = vpop.xlane.xlu1 %616 }
 0x13e   : > { %v621_v17 = vcvt.f32.s32 %v619_v15  ;;  %v620_v20 = vcvt.f32.s32 %v617_v16 }
 0x140   : > { %v622_v18 = vshll.u32 %v621_v17, 16 }
 0x141   : > { %v700_v27 = vpop.permute.xlu1 %699 }
 0x142   : > { %v623_v21 = vadd.s32 %v622_v18, %v620_v20  ;;  %703 = vst.msk [vmem:[#allocation2] sm:$0xff] %vm702_vm7, %v700_v27  ;;  %vm1174_vm7 = vcmask 260096  }
 0x143   : > { %711 = vst.msk [vmem:[#allocation2 + $0x7] sm:$0x1] %vm710_vm8, %v2362_v11  ;;  %vm1936_vm8 = vcmask 1043459  }
 0x144   : > { %vm626_vm3 = vcmp.eq.s32.totalorder %v2539_v19, %v623_v21 }
 0x145   : > { %v2094_v22 = vsel %vm626_vm3, 1.0, %v2362_v11  ;;  %v706_v36 = vpop.permute.xlu1 %705  ;;  %vm1165_vm3 = vcmask 1048320  }
 0x146   : > { %v629_v23 = vpack.c.bf16 %v2094_v22, %v2094_v22  ;;  %709 = vst.msk [vmem:[#allocation2] sm:$0x7f] %vm708_vm9, %v706_v36  ;;  %vm1938_vm9 = vcmask 1044484  }
 0x147   : > { %713 = vst.msk [vmem:[#allocation2] sm:$0x1] %vm712_vm10, %v2362_v11  ;;  %vm1940_vm10 = vcmask 1045509  }
 0x148   : > { %2173 = vmatmul.mubr.msk.bf16.vlgmr.msra.gmra.mxu0 %vm646_vm4, %v629_v23 }
 0x208   : > { %v684_v39 = vpop.f32.mrf.mxu0 }
 0x209   : > { %v690_v40 = vadd.f32 %v684_v39, %v2534_v13 }
 0x20a   : > { %v2174_v42 = vpop.f32.mrf.mxu0 }
 0x20b   : > { %691 = vst.msk [vmem:[%s591_s29] sm:$0xff] %vm646_vm4, %v690_v40  ;;  %721 = vst.msk [vmem:[#allocation2 + $0x8] sm:$0xff] %vm646_vm4, %v690_v40  ;;  %v722_v43 = vrot.slane %v690_v40, 1  ;;  %v715_v46 = vrot.slane %v690_v40, 7 }
 0x20c   : > { %v687_v44 = vpop.f32.mrf.mxu0  ;;  %729 = vst.msk [vmem:[#allocation2 + $0xf] sm:$0x1] %vm728_vm11, %v2362_v11  ;;  %vm1942_vm11 = vcmask 1046534  }
 0x20d   : > { %723 = vrot.lane.b32.xlu1 %v722_v43, %s2364_s25 }
 0x20e   : > { %v2175_v45 = vpop.f32.mrf.mxu0 }
 0x211   : > { %716 = vrot.lane.b32.xlu1 %v715_v46, %s2366_s22 }
 0x27f   : > { %v724_v47 = vpop.permute.xlu1 %723 }
 0x280   : > { %727 = vst.msk [vmem:[#allocation2 + $0x8] sm:$0x7f] %vm726_vm12, %v724_v47  ;;  %vm1944_vm12 = vcmask 1047559  }
 0x283   : > { %v717_v48 = vpop.permute.xlu1 %716 }
 0x284   : > { %720 = vst.msk [vmem:[#allocation2] sm:$0xfe] %vm719_vm13, %v717_v48  ;;  %vm1947_vm13 = vcmask 23552  }
 0x287   : > { %v731_v49 = vld [vmem:[#allocation2 + $0x8] sm:$0xff] }
 0x288   : > { %v733_v50 = vpack.c.bf16 %v731_v49, %v731_v49 }
 0x28a   : > { %2111 = vmatprep.mubr.msk.bf16.mxu1 %vm837_vm14, %v733_v50 }
 0x28b   : > { %v730_v51 = vld [vmem:[#allocation2] sm:$0xff] }
 0x28c   : > { %v732_v52 = vpack.c.bf16 %v730_v51, %v730_v51  ;;  %1156 = vst.msk [vmem:[#allocation2] sm:$0x1] %vm1155_vm15, %v2362_v11 }
 0x28e   : > { %874 = vmatmul.mubr.bf16.vlgmr.msra.gmra.mxu1 %v732_v52 }
 0x34e   : > { %v875_v54 = vpop.f32.mrf.mxu1 }
 0x34f   : > { %v876_v55 = vadd.f32 %v2098_v53, %v875_v54 }
 0x350   : > { %v877_v56 = vpop.f32.mrf.mxu1 }
 0x351   : > { %v881_v57 = vmax.f32 %v876_v55, 0.0 }
 0x352   : > { %v878_v58 = vpop.f32.mrf.mxu1 }
 0x353   : > { %888 = vrot.lane.b32.xlu0 %v881_v57, %s2365_s26  ;;  %885 = vrot.lane.b32.xlu1 %v881_v57, %s2366_s22 }
 0x354   : > { %v879_v59 = vpop.f32.mrf.mxu1 }
 0x3c5   : > { %v889_v4 = vpop.permute.xlu0 %888  ;;  %v886_v5 = vpop.permute.xlu1 %885 }
 0x3c6   : > { %v891_v6 = vcombine.low %v881_v57, %v889_v4  ;;  %v892_v7 = vcombine.high %v881_v57, %v889_v4  ;;  %v907_v8 = vcombine.high %v886_v5, %v2362_v11  ;;  %v914_v13 = vrot.slane %v886_v5, %v2583_v3 }
 0x3c8   : > { %v899_v10 = vrot.slane %v891_v6, %v2583_v3  ;;  %v906_v12 = vrot.slane %v892_v7, %v2583_v3  ;;  %v921_v14 = vrot.slane %v907_v8, %v2583_v3 }
 0x3ca   : > { %v922_v15 = vcombine.low %v899_v10, %v914_v13  ;;  %v923_v16 = vcombine.high %v899_v10, %v914_v13  ;;  %v939_v17 = vcombine.high %v906_v12, %v921_v14  ;;  %v938_v20 = vcombine.low %v906_v12, %v921_v14 }
 0x3cc   : > { %v930_v18 = vrot.slane %v922_v15, %v2587_v9  ;;  %v937_v23 = vrot.slane %v923_v16, %v2587_v9  ;;  %v953_v25 = vrot.slane %v939_v17, %v2587_v9  ;;  %v946_v27 = vrot.slane %v938_v20, %v2587_v9 }
 0x3ce   : > { %v959_v21 = vsel %vm958_vm0, %v930_v18, 0.0  ;;  %v954_v22 = vcombine.high %v930_v18, %v2362_v11  ;;  %v965_v26 = vsel %vm958_vm0, %v937_v23, 0.0  ;;  %v977_v28 = vsel %vm958_vm0, %v953_v25, 0.0 }
 0x3cf   : > { %960 = vadd.xlane.f32.xlu1 %v959_v21  ;;  %v971_v29 = vsel %vm958_vm0, %v946_v27, 0.0  ;;  %v955_v30 = vcombine.high %v937_v23, %v2362_v11  ;;  %v956_v32 = vcombine.high %v946_v27, %v2362_v11  ;;  %v957_v34 = vcombine.high %v953_v25, %v2362_v11 }
 0x3d0   : > { %v962_v24 = vsel %vm958_vm0, %v954_v22, 0.0 }
 0x3d1   : > { %963 = vadd.xlane.f32.xlu0 %v962_v24  ;;  %v968_v31 = vsel %vm958_vm0, %v955_v30, 0.0  ;;  %v974_v33 = vsel %vm958_vm0, %v956_v32, 0.0  ;;  %v980_v35 = vsel %vm958_vm0, %v957_v34, 0.0 }
 0x3d3   : > { %966 = vadd.xlane.f32.xlu1 %v965_v26 }
 0x3d5   : > { %978 = vadd.xlane.f32.xlu0 %v977_v28 }
 0x3d7   : > { %972 = vadd.xlane.f32.xlu1 %v971_v29 }
 0x3db   : > { %969 = vadd.xlane.f32.xlu1 %v968_v31 }
 0x3df   : > { %975 = vadd.xlane.f32.xlu1 %v974_v33 }
 0x3e3   : > { %981 = vadd.xlane.f32.xlu1 %v980_v35 }
 0x458   : > { %v961_v36 = vpop.xlane.xlu1 %960 }
 0x459   : > { %v984_v37 = vmul.f32 0.03125, %v961_v36 }
 0x45a   : > { %v964_v38 = vpop.xlane.xlu0 %963 }
 0x45b   : > { %v2609_v39 = vsub.f32 %v930_v18, %v984_v37  ;;  %v985_v40 = vmul.f32 0.03125, %v964_v38 }
 0x45c   : > { %v967_v41 = vpop.xlane.xlu1 %966 }
 0x45d   : > { %v2611_v42 = vsub.f32 %v954_v22, %v985_v40  ;;  %v986_v43 = vmul.f32 0.03125, %v967_v41  ;;  %v1000_v44 = vmul.f32 %v2609_v39, %v2609_v39 }
 0x45e   : > { %v979_v45 = vpop.xlane.xlu0 %978 }
 0x45f   : > { %v2615_v46 = vsub.f32 %v937_v23, %v986_v43  ;;  %v990_v47 = vmul.f32 0.03125, %v979_v45  ;;  %v1008_v48 = vsel %vm958_vm0, %v1000_v44, 0.0  ;;  %v1001_v49 = vmul.f32 %v2611_v42, %v2611_v42 }
 0x460   : > { %1009 = vadd.xlane.f32.xlu0 %v1008_v48  ;;  %v973_v50 = vpop.xlane.xlu1 %972 }
 0x461   : > { %v988_v51 = vmul.f32 0.03125, %v973_v50  ;;  %v1011_v52 = vsel %vm958_vm0, %v1001_v49, 0.0  ;;  %v1002_v53 = vmul.f32 %v2615_v46, %v2615_v46  ;;  %v2623_v54 = vsub.f32 %v953_v25, %v990_v47 }
 0x462   : > { %1012 = vadd.xlane.f32.xlu1 %v1011_v52 }
 0x463   : > { %v2625_v55 = vsub.f32 %v946_v27, %v988_v51  ;;  %v1014_v56 = vsel %vm958_vm0, %v1002_v53, 0.0  ;;  %v1006_v62 = vmul.f32 %v2623_v54, %v2623_v54 }
 0x464   : > { %1015 = vadd.xlane.f32.xlu0 %v1014_v56  ;;  %v970_v57 = vpop.xlane.xlu1 %969 }
 0x465   : > { %v987_v58 = vmul.f32 0.03125, %v970_v57  ;;  %v1004_v59 = vmul.f32 %v2625_v55, %v2625_v55  ;;  %v1026_v5 = vsel %vm958_vm0, %v1006_v62, 0.0 }
 0x467   : > { %v995_v60 = vsub.f32 %v955_v30, %v987_v58  ;;  %v1020_v61 = vsel %vm958_vm0, %v1004_v59, 0.0 }
 0x468   : > { %1021 = vadd.xlane.f32.xlu0 %v1020_v61  ;;  %v976_v63 = vpop.xlane.xlu1 %975 }
 0x469   : > { %v989_v0 = vmul.f32 0.03125, %v976_v63  ;;  %v1003_v2 = vmul.f32 %v995_v60, %v995_v60 }
 0x46b   : > { %v997_v4 = vsub.f32 %v956_v32, %v989_v0  ;;  %v1017_v6 = vsel %vm958_vm0, %v1003_v2, 0.0 }
 0x46c   : > { %1027 = vadd.xlane.f32.xlu0 %v1026_v5  ;;  %1018 = vadd.xlane.f32.xlu1 %v1017_v6  ;;  %v982_v7 = vpop.xlane.xlu1 %981 }
 0x46d   : > { %v991_v8 = vmul.f32 0.03125, %v982_v7  ;;  %v1005_v10 = vmul.f32 %v997_v4, %v997_v4 }
 0x46f   : > { %v999_v12 = vsub.f32 %v957_v34, %v991_v8  ;;  %v1023_v13 = vsel %vm958_vm0, %v1005_v10, 0.0  ;;  %v2239_v10 = vld [vmem:[#allocation5 + $0x78] sm:$0xff]  }
 0x470   : > { %1024 = vadd.xlane.f32.xlu1 %v1023_v13  ;;  %v2241_v13 = vld [vmem:[#allocation5 + $0x70] sm:$0xff]   ;;  %2143 = vmatprep.subr.bf16.mxu0 %v2239_v10 }
 0x471   : > { %v1007_v14 = vmul.f32 %v999_v12, %v999_v12 }
 0x473   : > { %v1029_v15 = vsel %vm958_vm0, %v1007_v14, 0.0 }
 0x474   : > { %1030 = vadd.xlane.f32.xlu1 %v1029_v15 }
 0x4e9   : > { %v1010_v16 = vpop.xlane.xlu0 %1009 }
 0x4ea   : > { %v1032_v20 = vmul.f32 0.03125, %v1010_v16 }
 0x4eb   : > { %v1013_v18 = vpop.xlane.xlu1 %1012 }
 0x4ec   : > { %v1033_v21 = vmul.f32 0.03125, %v1013_v18  ;;  %v1040_v24 = vadd.f32 1e-05, %v1032_v20  ;;  %v2242_v20 = vld [vmem:[#allocation5 + $0x30] sm:$0xff]  }
 0x4ed   : > { %v1016_v17 = vpop.xlane.xlu0 %1015 }
 0x4ee   : > { %v1034_v23 = vmul.f32 0.03125, %v1016_v17  ;;  %v1041_v25 = vadd.f32 1e-05, %v1033_v21  ;;  %2257 = vrsqrt.f32 %v1040_v24  ;;  %v2243_v21 = vld [vmem:[#allocation5 + $0x68] sm:$0xff]   ;;  %v2246_v24 = vld [vmem:[#allocation5 + $0x20] sm:$0xff]  }
 0x4f0   : > { %v1042_v28 = vadd.f32 1e-05, %v1034_v23  ;;  %2259 = vrsqrt.f32 %v1041_v25  ;;  %v2245_v23 = vld [vmem:[#allocation5 + $0x60] sm:$0xff]   ;;  %v2247_v25 = vld [vmem:[#allocation5 + $0x58] sm:$0xff]  }
 0x4f1   : > { %v1022_v22 = vpop.xlane.xlu0 %1021 }
 0x4f2   : > { %v1036_v29 = vmul.f32 0.03125, %v1022_v22  ;;  %2261 = vrsqrt.f32 %v1042_v28  ;;  %v2244_v22 = vld [vmem:[#allocation5 + $0x28] sm:$0xff]   ;;  %v2250_v28 = vld [vmem:[#allocation5 + $0x10] sm:$0xff]  }
 0x4f4   : > { %v1044_v35 = vadd.f32 1e-05, %v1036_v29  ;;  %v2251_v29 = vld [vmem:[#allocation5 + $0x48] sm:$0xff]  }
 0x4f5   : > { %v1028_v26 = vpop.xlane.xlu0 %1027  ;;  %v1019_v27 = vpop.xlane.xlu1 %1018 }
 0x4f6   : > { %v1038_v30 = vmul.f32 0.03125, %v1028_v26  ;;  %v1035_v31 = vmul.f32 0.03125, %v1019_v27  ;;  %v2248_v26 = vld [vmem:[#allocation5 + $0x18] sm:$0xff]   ;;  %v2249_v27 = vld [vmem:[#allocation5 + $0x50] sm:$0xff]  }
 0x4f8   : > { %v1046_v32 = vadd.f32 1e-05, %v1038_v30  ;;  %v1043_v33 = vadd.f32 1e-05, %v1035_v31  ;;  %v2252_v30 = vld [vmem:[#allocation5 + $0x8] sm:$0xff]   ;;  %v2253_v31 = vld [vmem:[#allocation5 + $0x40] sm:$0xff]  }
 0x4f9   : > { %v1025_v34 = vpop.xlane.xlu1 %1024 }
 0x4fa   : > { %v1037_v36 = vmul.f32 0.03125, %v1025_v34  ;;  %2263 = vrsqrt.f32 %v1043_v33  ;;  %v2112_v33 = vld [vmem:[%s2808_s7] ss:$0 sm:$0xff] }
 0x4fb   : > { %2265 = vrsqrt.f32 %v1046_v32  ;;  %v2258_v43 = vpop.eup %2257 }
 0x4fc   : > { %v1045_v37 = vadd.f32 1e-05, %v1037_v36  ;;  %2267 = vrsqrt.f32 %v1044_v35  ;;  %v1056_v53 = vmul.f32 %v2258_v43, %v2609_v39  ;;  %v2254_v36 = vld [vmem:[#allocation5] sm:$0xff]  }
 0x4fd   : > { %v1031_v38 = vpop.xlane.xlu1 %1030  ;;  %v2260_v44 = vpop.eup %2259 }
 0x4fe   : > { %v1039_v40 = vmul.f32 0.03125, %v1031_v38  ;;  %2269 = vrsqrt.f32 %v1045_v37  ;;  %v1057_v50 = vmul.f32 %v2260_v44, %v2611_v42  ;;  %v2113_v38 = vld [vmem:[%s2809_s8] ss:$0 sm:$0xff] }
 0x4ff   : > { %v2262_v45 = vpop.eup %2261 }
 0x500   : > { %v1047_v41 = vadd.f32 1e-05, %v1039_v40  ;;  %v1058_v51 = vmul.f32 %v2262_v45, %v2615_v46 }
 0x502   : > { %2271 = vrsqrt.f32 %v1047_v41  ;;  %v1064_v61 = vcombine.low %v1056_v53, %v1058_v51  ;;  %v2255_v51 = vld [vmem:[#allocation5 + $0x88] sm:$0xff]   ;;  %v2256_v53 = vld [vmem:[#allocation5 + $0x80] sm:$0xff]  }
 0x504   : > { %v1071_v42 = vrot.slane %v1064_v61, %v2583_v3 }
 0x507   : > { %v2264_v47 = vpop.eup %2263 }
 0x508   : > { %v2266_v48 = vpop.eup %2265  ;;  %v1059_v49 = vmul.f32 %v2264_v47, %v995_v60 }
 0x509   : > { %v2268_v52 = vpop.eup %2267  ;;  %v1062_v56 = vmul.f32 %v2266_v48, %v2623_v54 }
 0x50a   : > { %v1072_v57 = vcombine.low %v1057_v50, %v1059_v49  ;;  %v1060_v59 = vmul.f32 %v2268_v52, %v2625_v55  ;;  %v2240_v55 = vld [vmem:[#allocation5 + $0x38] sm:$0xff]  }
 0x50b   : > { %v2270_v58 = vpop.eup %2269  ;;  %2144 = vmatpush3.bf16.msra.mxu0 %v2240_v55 }
 0x50c   : > { %v1061_v63 = vmul.f32 %v2270_v58, %v997_v4  ;;  %v1079_v2 = vrot.slane %v1072_v57, %v2583_v3  ;;  %v1080_v60 = vcombine.low %v1060_v59, %v1062_v56  ;;  %2145 = vmatprep.subr.bf16.mxu0 %v2241_v13 }
 0x50e   : > { %v1087_v46 = vrot.slane %v1080_v60, %v2583_v3  ;;  %v1097_v6 = vcombine.high %v1071_v42, %v1079_v2  ;;  %v1096_v54 = vcombine.low %v1071_v42, %v1079_v2 }
 0x50f   : > { %v2272_v62 = vpop.eup %2271  ;;  %2146 = vmatpush3.bf16.msra.mxu0 %v2242_v20 }
 0x510   : > { %v1063_v0 = vmul.f32 %v2272_v62, %v999_v12  ;;  %v1111_v4 = vrot.slane %v1097_v6, %v2587_v9  ;;  %v1104_v14 = vrot.slane %v1096_v54, %v2587_v9  ;;  %2147 = vmatprep.subr.bf16.mxu0 %v2243_v21 }
 0x512   : > { %v1088_v5 = vcombine.low %v1061_v63, %v1063_v0  ;;  %v2114_v63 = vld [vmem:[%s2811_s10] ss:$0 sm:$0xff] }
 0x513   : > { %2148 = vmatpush3.bf16.msra.mxu0 %v2244_v22 }
 0x514   : > { %v1095_v39 = vrot.slane %v1088_v5, %v2583_v3  ;;  %2149 = vmatprep.subr.bf16.mxu0 %v2245_v23 }
 0x516   : > { %v1113_v7 = vcombine.high %v1087_v46, %v1095_v39  ;;  %v1112_v8 = vcombine.low %v1087_v46, %v1095_v39 }
 0x517   : > { %2150 = vmatpush3.bf16.msra.mxu0 %v2246_v24 }
 0x518   : > { %v1127_v12 = vrot.slane %v1113_v7, %v2587_v9  ;;  %v1120_v15 = vrot.slane %v1112_v8, %v2587_v9  ;;  %2151 = vmatprep.subr.bf16.mxu0 %v2247_v25 }
 0x51a   : > { %v1130_v16 = vcombine.low %v1111_v4, %v1127_v12  ;;  %v1129_v17 = vcombine.high %v1104_v14, %v1120_v15  ;;  %v1128_v18 = vcombine.low %v1104_v14, %v1120_v15 }
 0x51b   : > { %2152 = vmatpush3.bf16.msra.mxu0 %v2248_v26 }
 0x51c   : > { %1136 = vrot.lane.b32.xlu1 %v1130_v16, %s2365_s26  ;;  %1132 = vrot.lane.b32.xlu0 %v1129_v17, %s2364_s25 }
 0x51d   : > { %2153 = vmatprep.subr.bf16.mxu0 %v2249_v27 }
 0x51f   : > { %2154 = vmatpush3.bf16.msra.mxu0 %v2250_v28 }
 0x520   : > { %2155 = vmatprep.subr.bf16.mxu0 %v2251_v29 }
 0x523   : > { %2156 = vmatpush3.bf16.msra.mxu0 %v2252_v30 }
 0x524   : > { %2157 = vmatprep.subr.bf16.mxu0 %v2253_v31 }
 0x527   : > { %2158 = vmatpush3.bf16.msra.mxu0 %v2254_v36 }
 0x528   : > { %2176 = vmatprep.subr.bf16.mxu0 %v2362_v11 }
 0x58e   : > { %v1137_v32 = vpop.permute.xlu1 %1136  ;;  %v1133_v34 = vpop.permute.xlu0 %1132 }
 0x58f   : > { %v1139_v35 = vsel %vm646_vm4, %v1128_v18, %v1133_v34 }
 0x590   : > { %v1140_v37 = vsel %vm837_vm14, %v1139_v35, %v1137_v32 }
 0x591   : > { %v1147_v40 = vmul.f32 %v2112_v33, %v1140_v37 }
 0x593   : > { %v1154_v41 = vadd.f32 %v2113_v38, %v1147_v40 }
 0x595   : > { %1162 = vrot.lane.b32.xlu1 %v1154_v41, %s2366_s22  ;;  %v1158_v43 = vrot.slane %v1154_v41, 7  ;;  %v1168_v44 = vrot.slane %v1154_v41, 1 }
 0x597   : > { %1169 = vrot.lane.b32.xlu0 %v1168_v44, %s2365_s26  ;;  %1161 = vst.msk [vmem:[#allocation2] sm:$0xfe] %vm1160_vm1, %v1158_v43 }
 0x607   : > { %v1163_v45 = vpop.permute.xlu1 %1162 }
 0x608   : > { %1166 = vst.msk [vmem:[#allocation2] sm:$0xff] %vm1165_vm3, %v1163_v45 }
 0x609   : > { %1167 = vst.msk [vmem:[#allocation2 + $0x8] sm:$0xff] %vm837_vm14, %v1163_v45  ;;  %v1170_v47 = vpop.permute.xlu0 %1169 }
 0x60a   : > { %1177 = vst.msk [vmem:[#allocation2 + $0xf] sm:$0x1] %vm1176_vm5, %v2362_v11 }
 0x60b   : > { %1173 = vst.msk [vmem:[#allocation2 + $0x8] sm:$0x7f] %vm1172_vm6, %v1170_v47 }
 0x60c   : > { %1175 = vst.msk [vmem:[#allocation2 + $0x10] sm:$0x7f] %vm1174_vm7, %v1170_v47 }
 0x60f   : > { %v1179_v48 = vld [vmem:[#allocation2] sm:$0xff] }
 0x610   : > { %v1182_v52 = vpack.c.bf16 %v1179_v48, %v1179_v48 }
 0x612   : > { %v1180_v49 = vld [vmem:[#allocation2 + $0x8] sm:$0xff] }
 0x613   : > { %v1183_v50 = vpack.c.bf16 %v1180_v49, %v1180_v49  ;;  %v1181_v56 = vld [vmem:[#allocation2 + $0x10] sm:$0xff] }
 0x614   : > { %v1184_v57 = vpack.c.bf16 %v1181_v56, %v1181_v56 }
 0x615   : > { %1371 = vmatprep.mubr.bf16.mxu0 %v1183_v50 }
 0x616   : > { %1372 = vmatmul.mubr.bf16.vlgmr.msra.gmra.mxu0 %v1182_v52 }
 0x617   : > { %2177 = vmatpush3.bf16.msra.mxu0 %v2255_v51  ;;  %2180 = vmatprep.mubr.msk.bf16.mxu0 %vm2363_vm2, %v2362_v11  ;;  %vm1932_vm2 = vcmask 1041409  }
 0x618   : > { %2178 = vmatprep.subr.bf16.mxu0 %v2362_v11 }
 0x61b   : > { %2179 = vmatpush3.bf16.msra.mxu0 %v2256_v53 }
 0x61e   : > { %2181 = vmatmul.mubr.msk.bf16.vlgmr.msra.gmra.mxu0 %vm646_vm4, %v1184_v57 }
 0x6d6   : > { %v2159_v58 = vpop.f32.mrf.mxu0 }
 0x6d8   : > { %v2160_v59 = vpop.f32.mrf.mxu0 }
 0x6d9   : > { %v2161_v61 = vadd.f32 %v2160_v59, %v2159_v58 }
 0x6da   : > { %v2162_v62 = vpop.f32.mrf.mxu0 }
 0x6db   : > { %v1374_v2 = vadd.f32 %v2161_v61, %v2114_v63 }
 0x6dc   : > { %v2163_v0 = vpop.f32.mrf.mxu0 }
 0x6de   : > { %v1413_v60 = vpop.f32.mrf.mxu0 }
 0x6df   : > { %v1414_v42 = vadd.f32 %v1413_v60, %v1374_v2 }
 0x6e0   : > { %v2182_v5 = vpop.f32.mrf.mxu0 }
 0x6e1   : > { %v1419_v46 = vmax.f32 %v1414_v42, 0.0 }
 0x6e2   : > { %v1416_v39 = vpop.f32.mrf.mxu0 }
 0x6e3   : > { %1426 = vrot.lane.b32.xlu0 %v1419_v46, %s2365_s26  ;;  %1423 = vrot.lane.b32.xlu1 %v1419_v46, %s2366_s22 }
 0x6e4   : > { %v2183_v6 = vpop.f32.mrf.mxu0 }
 0x755   : > { %v1427_v54 = vpop.permute.xlu0 %1426  ;;  %v1424_v7 = vpop.permute.xlu1 %1423 }
 0x756   : > { %v1429_v8 = vcombine.low %v1419_v46, %v1427_v54  ;;  %v1430_v10 = vcombine.high %v1419_v46, %v1427_v54  ;;  %v1445_v55 = vcombine.high %v1424_v7, %v2362_v11  ;;  %v1452_v12 = vrot.slane %v1424_v7, %v2583_v3 }
 0x758   : > { %v1437_v13 = vrot.slane %v1429_v8, %v2583_v3  ;;  %v1444_v4 = vrot.slane %v1430_v10, %v2583_v3  ;;  %v1459_v14 = vrot.slane %v1445_v55, %v2583_v3 }
 0x75a   : > { %v1460_v15 = vcombine.low %v1437_v13, %v1452_v12  ;;  %v1461_v16 = vcombine.high %v1437_v13, %v1452_v12  ;;  %v1476_v17 = vcombine.low %v1444_v4, %v1459_v14  ;;  %v1477_v21 = vcombine.high %v1444_v4, %v1459_v14 }
 0x75c   : > { %v1475_v18 = vrot.slane %v1461_v16, %v2587_v9  ;;  %v1468_v20 = vrot.slane %v1460_v15, %v2587_v9  ;;  %v1484_v25 = vrot.slane %v1476_v17, %v2587_v9  ;;  %v1491_v26 = vrot.slane %v1477_v21, %v2587_v9 }
 0x75e   : > { %v1502_v22 = vsel %vm958_vm0, %v1475_v18, 0.0  ;;  %v1496_v23 = vsel %vm958_vm0, %v1468_v20, 0.0  ;;  %v1493_v24 = vcombine.high %v1475_v18, %v2362_v11  ;;  %v1508_v28 = vsel %vm958_vm0, %v1484_v25, 0.0 }
 0x75f   : > { %1503 = vadd.xlane.f32.xlu0 %v1502_v22  ;;  %1497 = vadd.xlane.f32.xlu1 %v1496_v23  ;;  %v1492_v29 = vcombine.high %v1468_v20, %v2362_v11  ;;  %v1494_v30 = vcombine.high %v1484_v25, %v2362_v11  ;;  %v1495_v33 = vcombine.high %v1491_v26, %v2362_v11  ;;  %v1514_v34 = vsel %vm958_vm0, %v1491_v26, 0.0 }
 0x760   : > { %v1505_v27 = vsel %vm958_vm0, %v1493_v24, 0.0 }
 0x761   : > { %v1499_v31 = vsel %vm958_vm0, %v1492_v29, 0.0  ;;  %v1511_v32 = vsel %vm958_vm0, %v1494_v30, 0.0  ;;  %v1517_v35 = vsel %vm958_vm0, %v1495_v33, 0.0 }
 0x763   : > { %1506 = vadd.xlane.f32.xlu1 %v1505_v27  ;;  %1509 = vadd.xlane.f32.xlu0 %v1508_v28 }
 0x767   : > { %1500 = vadd.xlane.f32.xlu0 %v1499_v31  ;;  %1512 = vadd.xlane.f32.xlu1 %v1511_v32 }
 0x76b   : > { %1515 = vadd.xlane.f32.xlu0 %v1514_v34  ;;  %1518 = vadd.xlane.f32.xlu1 %v1517_v35 }
 0x7e8   : > { %v1504_v36 = vpop.xlane.xlu0 %1503  ;;  %v1498_v37 = vpop.xlane.xlu1 %1497 }
 0x7e9   : > { %v1522_v38 = vmul.f32 0.03125, %v1504_v36  ;;  %v1520_v40 = vmul.f32 0.03125, %v1498_v37 }
 0x7eb   : > { %v2695_v41 = vsub.f32 %v1475_v18, %v1522_v38  ;;  %v2697_v43 = vsub.f32 %v1468_v20, %v1520_v40 }
 0x7ec   : > { %v1507_v44 = vpop.xlane.xlu1 %1506  ;;  %v1510_v45 = vpop.xlane.xlu0 %1509 }
 0x7ed   : > { %v1524_v47 = vmul.f32 0.03125, %v1510_v45  ;;  %v1536_v48 = vmul.f32 %v2697_v43, %v2697_v43  ;;  %v1523_v49 = vmul.f32 0.03125, %v1507_v44  ;;  %v1538_v52 = vmul.f32 %v2695_v41, %v2695_v41 }
 0x7ef   : > { %v2701_v50 = vsub.f32 %v1484_v25, %v1524_v47  ;;  %v1544_v51 = vsel %vm958_vm0, %v1536_v48, 0.0  ;;  %v2706_v58 = vsub.f32 %v1493_v24, %v1523_v49  ;;  %v1550_v62 = vsel %vm958_vm0, %v1538_v52, 0.0 }
 0x7f0   : > { %1545 = vadd.xlane.f32.xlu0 %v1544_v51  ;;  %v1501_v53 = vpop.xlane.xlu0 %1500  ;;  %v1513_v56 = vpop.xlane.xlu1 %1512 }
 0x7f1   : > { %v1521_v57 = vmul.f32 0.03125, %v1501_v53  ;;  %v1525_v59 = vmul.f32 0.03125, %v1513_v56  ;;  %v1540_v63 = vmul.f32 %v2701_v50, %v2701_v50  ;;  %v1539_v46 = vmul.f32 %v2706_v58, %v2706_v58 }
 0x7f3   : > { %v2708_v61 = vsub.f32 %v1492_v29, %v1521_v57  ;;  %v2715_v5 = vsub.f32 %v1494_v30, %v1525_v59  ;;  %v1556_v54 = vsel %vm958_vm0, %v1540_v63, 0.0  ;;  %v1553_v13 = vsel %vm958_vm0, %v1539_v46, 0.0 }
 0x7f4   : > { %1551 = vadd.xlane.f32.xlu0 %v1550_v62  ;;  %v1516_v0 = vpop.xlane.xlu0 %1515  ;;  %v1519_v2 = vpop.xlane.xlu1 %1518 }
 0x7f5   : > { %v1526_v60 = vmul.f32 0.03125, %v1516_v0  ;;  %v1537_v42 = vmul.f32 %v2708_v61, %v2708_v61  ;;  %v1527_v6 = vmul.f32 0.03125, %v1519_v2  ;;  %v1541_v4 = vmul.f32 %v2715_v5, %v2715_v5 }
 0x7f7   : > { %v1534_v39 = vsub.f32 %v1491_v26, %v1526_v60  ;;  %v1547_v7 = vsel %vm958_vm0, %v1537_v42, 0.0  ;;  %v1535_v10 = vsub.f32 %v1495_v33, %v1527_v6  ;;  %v1559_v12 = vsel %vm958_vm0, %v1541_v4, 0.0 }
 0x7f8   : > { %1557 = vadd.xlane.f32.xlu0 %v1556_v54  ;;  %1548 = vadd.xlane.f32.xlu1 %v1547_v7 }
 0x7f9   : > { %v1542_v8 = vmul.f32 %v1534_v39, %v1534_v39  ;;  %v1543_v14 = vmul.f32 %v1535_v10, %v1535_v10 }
 0x7fb   : > { %v1562_v55 = vsel %vm958_vm0, %v1542_v8, 0.0  ;;  %v1565_v15 = vsel %vm958_vm0, %v1543_v14, 0.0 }
 0x7fc   : > { %1563 = vadd.xlane.f32.xlu0 %v1562_v55  ;;  %1554 = vadd.xlane.f32.xlu1 %v1553_v13 }
 0x800   : > { %1560 = vadd.xlane.f32.xlu1 %v1559_v12 }
 0x804   : > { %1566 = vadd.xlane.f32.xlu1 %v1565_v15 }
 0x879   : > { %v1546_v16 = vpop.xlane.xlu0 %1545 }
 0x87a   : > { %v1568_v18 = vmul.f32 0.03125, %v1546_v16 }
 0x87c   : > { %v1576_v24 = vadd.f32 1e-05, %v1568_v18 }
 0x87d   : > { %v1552_v17 = vpop.xlane.xlu0 %1551 }
 0x87e   : > { %v1570_v20 = vmul.f32 0.03125, %v1552_v17  ;;  %2273 = vrsqrt.f32 %v1576_v24  ;;  %v2134_v17 = vld [vmem:[%s2812_s11] ss:$0 sm:$0xff] }
 0x87f   : > { %v2136_v24 = vld [vmem:[%s2814_s13] ss:$0 sm:$0xff] }
 0x880   : > { %v1578_v25 = vadd.f32 1e-05, %v1570_v20 }
 0x881   : > { %v1558_v21 = vpop.xlane.xlu0 %1557  ;;  %v1549_v22 = vpop.xlane.xlu1 %1548 }
 0x882   : > { %v1569_v23 = vmul.f32 0.03125, %v1549_v22  ;;  %v1572_v28 = vmul.f32 0.03125, %v1558_v21  ;;  %2275 = vrsqrt.f32 %v1578_v25  ;;  %v2135_v21 = vld [vmem:[%s2813_s12] ss:$0 sm:$0xff] }
 0x884   : > { %v1577_v29 = vadd.f32 1e-05, %v1569_v23  ;;  %v1580_v35 = vadd.f32 1e-05, %v1572_v28 }
 0x885   : > { %v1564_v26 = vpop.xlane.xlu0 %1563  ;;  %v1555_v27 = vpop.xlane.xlu1 %1554 }
 0x886   : > { %v1574_v30 = vmul.f32 0.03125, %v1564_v26  ;;  %v1571_v31 = vmul.f32 0.03125, %v1555_v27  ;;  %2277 = vrsqrt.f32 %v1577_v29 }
 0x888   : > { %v1582_v32 = vadd.f32 1e-05, %v1574_v30  ;;  %v1579_v33 = vadd.f32 1e-05, %v1571_v31 }
 0x889   : > { %v1561_v34 = vpop.xlane.xlu1 %1560 }
 0x88a   : > { %v1573_v36 = vmul.f32 0.03125, %v1561_v34  ;;  %2279 = vrsqrt.f32 %v1579_v33 }
 0x88b   : > { %2281 = vrsqrt.f32 %v1582_v32  ;;  %v2274_v45 = vpop.eup %2273 }
 0x88c   : > { %v1581_v37 = vadd.f32 1e-05, %v1573_v36  ;;  %2283 = vrsqrt.f32 %v1580_v35  ;;  %v1592_v59 = vmul.f32 %v2274_v45, %v2697_v43 }
 0x88d   : > { %v1567_v38 = vpop.xlane.xlu1 %1566 }
 0x88e   : > { %v1575_v40 = vmul.f32 0.03125, %v1567_v38  ;;  %2285 = vrsqrt.f32 %v1581_v37 }
 0x88f   : > { %v2276_v47 = vpop.eup %2275 }
 0x890   : > { %v1583_v44 = vadd.f32 1e-05, %v1575_v40  ;;  %v1594_v56 = vmul.f32 %v2276_v47, %v2695_v41 }
 0x892   : > { %2287 = vrsqrt.f32 %v1583_v44  ;;  %v1600_v60 = vcombine.low %v1592_v59, %v1594_v56 }
 0x893   : > { %v2278_v48 = vpop.eup %2277 }
 0x894   : > { %v1593_v53 = vmul.f32 %v2278_v48, %v2708_v61  ;;  %v1607_v61 = vrot.slane %v1600_v60, %v2583_v3 }
 0x897   : > { %v2280_v49 = vpop.eup %2279 }
 0x898   : > { %v2282_v51 = vpop.eup %2281  ;;  %v1595_v52 = vmul.f32 %v2280_v49, %v2706_v58 }
 0x899   : > { %v2284_v57 = vpop.eup %2283  ;;  %v1598_v62 = vmul.f32 %v2282_v51, %v1534_v39 }
 0x89a   : > { %v1608_v63 = vcombine.low %v1593_v53, %v1595_v52  ;;  %v1596_v2 = vmul.f32 %v2284_v57, %v2701_v50 }
 0x89b   : > { %v2286_v0 = vpop.eup %2285 }
 0x89c   : > { %v1597_v46 = vmul.f32 %v2286_v0, %v2715_v5  ;;  %v1615_v54 = vrot.slane %v1608_v63, %v2583_v3  ;;  %v1616_v58 = vcombine.low %v1596_v2, %v1598_v62 }
 0x89e   : > { %v1623_v41 = vrot.slane %v1616_v58, %v2583_v3  ;;  %v1633_v39 = vcombine.high %v1607_v61, %v1615_v54  ;;  %v1632_v8 = vcombine.low %v1607_v61, %v1615_v54 }
 0x89f   : > { %v2288_v42 = vpop.eup %2287 }
 0x8a0   : > { %v1599_v6 = vmul.f32 %v2288_v42, %v1535_v10  ;;  %v1647_v50 = vrot.slane %v1633_v39, %v2587_v9  ;;  %v1640_v5 = vrot.slane %v1632_v8, %v2587_v9  ;;  %v1822_v39 = vsub.s32 0, %v2580_v1 }
 0x8a2   : > { %v1624_v7 = vcombine.low %v1597_v46, %v1599_v6 }
 0x8a4   : > { %v1631_v43 = vrot.slane %v1624_v7, %v2583_v3 }
 0x8a6   : > { %v1649_v55 = vcombine.high %v1623_v41, %v1631_v43  ;;  %v1648_v13 = vcombine.low %v1623_v41, %v1631_v43  ;;  %v1826_v43 = vsub.s32 1, %v2580_v1 }
 0x8a8   : > { %v1663_v4 = vrot.slane %v1649_v55, %v2587_v9  ;;  %v1656_v10 = vrot.slane %v1648_v13, %v2587_v9  ;;  %v1834_v55 = vsub.s32 3, %v2580_v1  ;;  %v1830_v13 = vsub.s32 2, %v2580_v1 }
 0x8aa   : > { %v1666_v12 = vcombine.low %v1647_v50, %v1663_v4  ;;  %v1665_v14 = vcombine.high %v1640_v5, %v1656_v10  ;;  %v1664_v15 = vcombine.low %v1640_v5, %v1656_v10 }
 0x8ac   : > { %1672 = vrot.lane.b32.xlu1 %v1666_v12, %s2365_s26  ;;  %1668 = vrot.lane.b32.xlu0 %v1665_v14, %s2364_s25  ;;  %v1842_v14 = vsub.s32 5, %v2580_v1 }
 0x91e   : > { %v1673_v16 = vpop.permute.xlu1 %1672  ;;  %v1669_v18 = vpop.permute.xlu0 %1668 }
 0x91f   : > { %v1675_v20 = vsel %vm646_vm4, %v1664_v15, %v1669_v18  ;;  %v1838_v15 = vsub.s32 4, %v2580_v1  ;;  %vm1934_vm4 = vcmask 1042434  }
 0x920   : > { %v1676_v22 = vsel %vm837_vm14, %v1675_v20, %v1673_v16 }
 0x921   : > { %v1683_v23 = vmul.f32 %v2134_v17, %v1676_v22 }
 0x923   : > { %v1690_v25 = vadd.f32 %v2135_v21, %v1683_v23  ;;  %v1850_v23 = vsub.s32 7, %v2580_v1 }
 0x925   : > { %v1698_v26 = vmul.f32 %v2136_v24, %v1690_v25  ;;  %v1846_v24 = vsub.s32 6, %v2580_v1 }
 0x927   : > { %1700 = vrot.lane.b32.xlu0 %v1698_v26, %s2366_s22  ;;  %1703 = vrot.lane.b32.xlu1 %v1698_v26, %s2365_s26  ;;  %s579_s22 = scalar_lea.vmem %s2802_s1, %s2510_s24 }
 0x928   : > { %v594_v60 = vld [vmem:[%s579_s22] sm:$0xff] }
 0x929   : > { %v1815_v42 = vsub.f32 1.0, %v594_v60 }
 0x999   : > { %v1701_v27 = vpop.permute.xlu0 %1700  ;;  %v1704_v28 = vpop.permute.xlu1 %1703 }
 0x99a   : > { %v1722_v29 = vcombine.high %v1701_v27, %v2362_v11  ;;  %v1706_v30 = vcombine.low %v1698_v26, %v1704_v28  ;;  %v1707_v31 = vcombine.high %v1698_v26, %v1704_v28  ;;  %v1729_v32 = vrot.slane %v1701_v27, %v2583_v3 }
 0x99c   : > { %v1736_v33 = vrot.slane %v1722_v29, %v2583_v3  ;;  %v1714_v34 = vrot.slane %v1706_v30, %v2583_v3  ;;  %v1721_v35 = vrot.slane %v1707_v31, %v2583_v3 }
 0x99e   : > { %v1738_v36 = vcombine.high %v1714_v34, %v1729_v32  ;;  %v1737_v37 = vcombine.low %v1714_v34, %v1729_v32  ;;  %v1753_v38 = vcombine.low %v1721_v35, %v1736_v33  ;;  %v1754_v45 = vcombine.high %v1721_v35, %v1736_v33 }
 0x9a0   : > { %v1752_v40 = vrot.slane %v1738_v36, %v2587_v9  ;;  %v1745_v44 = vrot.slane %v1737_v37, %v2587_v9  ;;  %v1761_v49 = vrot.slane %v1753_v38, %v2587_v9  ;;  %v1768_v53 = vrot.slane %v1754_v45, %v2587_v9  ;;  %v2137_v9 = vld [vmem:[%s2815_s14] ss:$0 sm:$0xff] }
 0x9a2   : > { %v1779_v47 = vsel %vm958_vm0, %v1752_v40, 0.0  ;;  %v1773_v48 = vsel %vm958_vm0, %v1745_v44, 0.0  ;;  %v1770_v51 = vcombine.high %v1752_v40, %v2362_v11  ;;  %v1785_v3 = vsel %vm958_vm0, %v1761_v49, 0.0 }
 0x9a3   : > { %1780 = vadd.xlane.f32.xlu0 %v1779_v47  ;;  %1774 = vadd.xlane.f32.xlu1 %v1773_v48  ;;  %v1771_v56 = vcombine.high %v1761_v49, %v2362_v11  ;;  %v1791_v57 = vsel %vm958_vm0, %v1768_v53, 0.0  ;;  %v1772_v62 = vcombine.high %v1768_v53, %v2362_v11  ;;  %v1769_v63 = vcombine.high %v1745_v44, %v2362_v11 }
 0x9a4   : > { %v1782_v52 = vsel %vm958_vm0, %v1770_v51, 0.0  ;;  %v1902_v40 = vsub.s32 %v2539_v19, %v2580_v1 }
 0x9a5   : > { %v1788_v59 = vsel %vm958_vm0, %v1771_v56, 0.0  ;;  %v1794_v0 = vsel %vm958_vm0, %v1772_v62, 0.0  ;;  %v1776_v2 = vsel %vm958_vm0, %v1769_v63, 0.0 }
 0x9a7   : > { %1786 = vadd.xlane.f32.xlu0 %v1785_v3  ;;  %1783 = vadd.xlane.f32.xlu1 %v1782_v52 }
 0x9ab   : > { %1792 = vadd.xlane.f32.xlu0 %v1791_v57  ;;  %1789 = vadd.xlane.f32.xlu1 %v1788_v59 }
 0x9af   : > { %1795 = vadd.xlane.f32.xlu1 %v1794_v0  ;;  %1777 = vadd.xlane.f32.xlu0 %v1776_v2 }
 0x9c0   : > { %1804 = vbcast.lane.b32.xlu1 %v2137_v9, 256 }
 0x9c5   : > { %1818 = vperm.xlu0 %2223, %v1815_v42  }
 0xa2c   : > { %v1781_v11 = vpop.xlane.xlu0 %1780  ;;  %v1775_v46 = vpop.xlane.xlu1 %1774 }
 0xa30   : > { %v1787_v6 = vpop.xlane.xlu0 %1786  ;;  %v1784_v54 = vpop.xlane.xlu1 %1783 }
 0xa34   : > { %v1790_v58 = vpop.xlane.xlu1 %1789  ;;  %v1793_v61 = vpop.xlane.xlu0 %1792 }
 0xa38   : > { %v1796_v7 = vpop.xlane.xlu1 %1795  ;;  %v1778_v41 = vpop.xlane.xlu0 %1777 }
 0xa3c   : > { %v1805_v8 = vpop.permute.xlu1 %1804 }
 0xa3d   : > { %v1808_v4 = vadd.f32 %v1805_v8, %v1778_v41  ;;  %v1807_v10 = vadd.f32 %v1805_v8, %v1775_v46  ;;  %v1810_v21 = vadd.f32 %v1805_v8, %v1784_v54  ;;  %v1809_v22 = vadd.f32 %v1805_v8, %v1781_v11 }
 0xa3e   : > { %v1812_v29 = vadd.f32 %v1805_v8, %v1790_v58  ;;  %v1811_v30 = vadd.f32 %v1805_v8, %v1787_v6  ;;  %v1814_v35 = vadd.f32 %v1805_v8, %v1796_v7  ;;  %v1813_v36 = vadd.f32 %v1805_v8, %v1793_v61 }
 0xa40   : > { %v1819_v50 = vpop.permute.xlu0 %1818 }
 0xa41   : > { %v1827_v5 = vrot.slane %v1819_v50, %v1826_v43  ;;  %v1823_v12 = vrot.slane %v1819_v50, %v1822_v39  ;;  %v1835_v18 = vrot.slane %v1819_v50, %v1834_v55  ;;  %v1831_v20 = vrot.slane %v1819_v50, %v1830_v13 }
 0xa42   : > { %v1843_v27 = vrot.slane %v1819_v50, %v1842_v14  ;;  %v1839_v28 = vrot.slane %v1819_v50, %v1838_v15  ;;  %v1851_v33 = vrot.slane %v1819_v50, %v1850_v23  ;;  %v1847_v34 = vrot.slane %v1819_v50, %v1846_v24 }
 0xa43   : > { %v1861_v16 = vmul.f32 %v1827_v5, %v1808_v4  ;;  %v1860_v17 = vmul.f32 %v1823_v12, %v1807_v10  ;;  %v1863_v25 = vmul.f32 %v1835_v18, %v1810_v21  ;;  %v1862_v26 = vmul.f32 %v1831_v20, %v1809_v22 }
 0xa44   : > { %v1865_v31 = vmul.f32 %v1843_v27, %v1812_v29  ;;  %v1864_v32 = vmul.f32 %v1839_v28, %v1811_v30  ;;  %v1867_v37 = vmul.f32 %v1851_v33, %v1814_v35  ;;  %v1866_v38 = vmul.f32 %v1847_v34, %v1813_v36 }
 0xa45   : > { %1880 = vperm.xlu0 %2223, %v1861_v16   ;;  %1877 = vperm.xlu1 %2224, %v1860_v17  }
 0xa49   : > { %1886 = vperm.xlu0 %2223, %v1863_v25   ;;  %1883 = vperm.xlu1 %2224, %v1862_v26  }
 0xa4d   : > { %1892 = vperm.xlu0 %2223, %v1865_v31   ;;  %1889 = vperm.xlu1 %2224, %v1864_v32  }
 0xa51   : > { %1898 = vperm.xlu0 %2223, %v1867_v37   ;;  %1895 = vperm.xlu1 %2224, %v1866_v38  }
 0xac0   : > { %v1881_v44 = vpop.permute.xlu0 %1880  ;;  %v1878_v45 = vpop.permute.xlu1 %1877 }
 0xac1   : > { %v1907_v47 = vrot.slane %v1881_v44, %v1902_v40  ;;  %v1903_v48 = vrot.slane %v1878_v45, %v1902_v40 }
 0xac3   : > { %v1933_v52 = vsel %vm1932_vm2, %v1907_v47, %v1903_v48 }
 0xac4   : > { %v1887_v49 = vpop.permute.xlu0 %1886  ;;  %v1884_v51 = vpop.permute.xlu1 %1883 }
 0xac5   : > { %v1911_v3 = vrot.slane %v1884_v51, %v1902_v40  ;;  %v1915_v53 = vrot.slane %v1887_v49, %v1902_v40 }
 0xac7   : > { %v1935_v56 = vsel %vm1934_vm4, %v1911_v3, %v1933_v52 }
 0xac8   : > { %v1893_v57 = vpop.permute.xlu0 %1892  ;;  %v1890_v59 = vpop.permute.xlu1 %1889  ;;  %v1937_v19 = vsel %vm1936_vm8, %v1915_v53, %v1935_v56 }
 0xac9   : > { %v1919_v62 = vrot.slane %v1890_v59, %v1902_v40  ;;  %v1923_v63 = vrot.slane %v1893_v57, %v1902_v40 }
 0xacb   : > { %v1939_v1 = vsel %vm1938_vm9, %v1919_v62, %v1937_v19 }
 0xacc   : > { %v1899_v0 = vpop.permute.xlu0 %1898  ;;  %v1896_v2 = vpop.permute.xlu1 %1895  ;;  %v1941_v42 = vsel %vm1940_vm10, %v1923_v63, %v1939_v1 }
 0xacd   : > { %v1931_v9 = vrot.slane %v1899_v0, %v1902_v40  ;;  %v1927_v60 = vrot.slane %v1896_v2, %v1902_v40 }
 0xacf   : > { %v1943_v11 = vsel %vm1942_vm11, %v1927_v60, %v1941_v42 }
 0xad0   : > { %v1945_v46 = vsel %vm1944_vm12, %v1931_v9, %v1943_v11 }
 0xad1   : > { %1948 = vst.msk [vmem:[%s587_s28] sm:$0xff] %vm1947_vm13, %v1945_v46 }
 0xad2 PF: > { %s29_s21 = sadd.s32 1, %s2355_s21  }
 0xad3   : > { %p26_p2 = scmp.ge.s32.totalorder %s29_s21, 4  }
 0xad5   :  { %28 = sbr.rel (!%p26_p2) target bundleno = 4 (0x4), region = 137 }
 0xada   :  { %1982 = vsyncpa [#allocation4], 1 }
 0xadb   :  { %1984 = vsyncpa [#allocation4 + $0x1], 1 }
 0xadc   :  { %1985 = vsyncpa [#allocation6], 1 }

</bundles_post_ra>
